<compile_context>
chip_gen: v7x
topology: tpu7x:2x2x1
jax: 0.10.0
libtpu: 0.0.40
codegen_flags: <defaults>
</compile_context>

<pallas_src>
import jax
import jax.numpy as jnp
from jax.experimental import pallas as pl
from jax.experimental.pallas import tpu as pltpu


# --------------------------------------------------------------------------
# Model definition helpers (match the PyTorch module's layer sizes).
# --------------------------------------------------------------------------
def _layer_sizes(num_input: int):
    n = num_input
    return [
        n,
        int(n * 0.75),
        int(n * 0.5),
        int(n * 0.33),
        int(n * 0.25),   # latent
        int(n * 0.33),
        int(n * 0.5),
        int(n * 0.75),
        n,
    ]


def _round_up(x: int, m: int) -> int:
    return ((x + m - 1) // m) * m


def _default_pack(num_input: int) -> int:
    """Pack factor so pack*num_input ~= the native MXU pass width.

    128 lanes on v2-v5 (4x128^2 MXU), 256 lanes on v6e / v7x (2x256^2 MXU).
    """
    try:
        kind = jax.devices()[0].device_kind.lower()
    except Exception:  # pragma: no cover - defensive
        kind = ""
    lane_target = 128
    if kind and not any(tag in kind for tag in ("v2", "v3", "v4", "v5")):
        lane_target = 256
    return max(1, lane_target // num_input)


def init_params(key, num_input: int):
    """Deterministic PyTorch-Linear-style init. Weights stored as (in, out)."""
    sizes = _layer_sizes(num_input)
    params = []
    for li in range(len(sizes) - 1):
        fan_in, fan_out = sizes[li], sizes[li + 1]
        key, kw, kb = jax.random.split(key, 3)
        bound = 1.0 / jnp.sqrt(jnp.float32(fan_in))
        w = jax.random.uniform(kw, (fan_in, fan_out), jnp.float32, -bound, bound)
        b = jax.random.uniform(kb, (fan_out,), jnp.float32, -bound, bound)
        params.append((w, b))
    return params


def pack_params(params, num_input: int, pack: int = 1, weight_dtype=jnp.float32):
    """Pack the 8 (W, b) pairs into lane-dense, zero-padded, block-diag slabs.

    w_slab: (L, PF, PF) with PF = pack*num_input and, for each copy k,
            w_slab[l, k*F : k*F+in_l, k*F : k*F+out_l] = W_l; zeros elsewhere.
    b_slab: (L, 1, PF)  with b_slab[l, 0, k*F : k*F+out_l] = b_l.
    Off-diagonal blocks are zero -> no cross-sample mixing; padded lanes stay
    exactly zero through every relu(h @ W + b), so packing is mathematically
    exact. Biases stay f32 regardless of weight dtype (f32 epilogue).
    """
    num_layers = len(params)
    feat = num_input
    pf = pack * feat
    w_slab = jnp.zeros((num_layers, pf, pf), jnp.float32)
    b_slab = jnp.zeros((num_layers, 1, pf), jnp.float32)
    for l, (w, b) in enumerate(params):
        fi, fo = w.shape
        for k in range(pack):
            off = k * feat
            w_slab = w_slab.at[l, off:off + fi, off:off + fo].set(w)
            b_slab = b_slab.at[l, 0, off:off + fo].set(b.reshape(-1))
    return w_slab.astype(weight_dtype), b_slab


# --------------------------------------------------------------------------
# Pallas kernel
# --------------------------------------------------------------------------
def autoencoder_kernel(x_ref, w_ref, b_ref, o_ref):
    """x_ref: (TM, PF); w_ref: (L, PF, PF); b_ref: (L, 1, PF); o_ref: (TM, PF).

    Computes h <- relu(h @ W_l + b_l) for all L packed layers (ReLU after the
    final layer too, matching the PyTorch module) on one batch tile.
    """
    num_layers = w_ref.shape[0]
    mxu_dtype = w_ref.dtype                    # f32 or bf16 (v6e/v7x MXU)

    h = x_ref[...].astype(jnp.float32)
    for l in range(num_layers):                # static unroll: 8 MXU passes
        acc = jnp.dot(h.astype(mxu_dtype), w_ref[l],
                      preferred_element_type=jnp.float32)
        h = jnp.maximum(acc + b_ref[l].astype(jnp.float32), 0.0)  # f32 VPU path
    o_ref[...] = h.astype(o_ref.dtype)


# --------------------------------------------------------------------------
# Wrapper
# --------------------------------------------------------------------------
def _choose_tile(rows: int, block_m: int) -> int:
    tm = max(8, min(block_m, _round_up(rows, 8)))
    tm = _round_up(tm, 8)
    # Keep >=2 grid tiles whenever there is more than one sublane-tile of
    # work, so ("parallel",) actually feeds both v7x TensorCores.
    if rows > 8 and (rows + tm - 1) // tm < 2:
        tm = max(8, _round_up((rows + 1) // 2, 8))
    return tm


def autoencoder_forward(x, w_slab, b_slab, *, block_m: int = 512):
    """Run the fused 8-layer autoencoder forward on TPU via Pallas.

    w_slab / b_slab must come from pack_params(); the pack factor is inferred
    from the slab width. f32 slabs are exact; bf16 slabs use the bf16 MXU
    path (f32 accumulation) and are recommended on v6e / v7x.
    """
    batch, num_input = x.shape
    num_layers, pf, pf2 = w_slab.shape
    assert pf == pf2
    pack = pf // num_input
    assert pack * num_input == pf, "slab width must be a multiple of num_input"

    # --- pack `pack` samples per lane row -------------------------------
    pad_b = (-batch) % pack
    if pad_b:
        x = jnp.pad(x, ((0, pad_b), (0, 0)))
    rows = (batch + pad_b) // pack
    xp = x.reshape(rows, pf)

    # --- batch-row tiling -------------------------------------------------
    tm = _choose_tile(rows, block_m)
    num_tiles = (rows + tm - 1) // tm
    padded_rows = num_tiles * tm
    if padded_rows != rows:
        xp = jnp.pad(xp, ((0, padded_rows - rows), (0, 0)))

    grid = (num_tiles,)

    # Advisory cost estimate (helps XLA schedule this small custom call).
    itemsize = jnp.dtype(x.dtype).itemsize
    cost = pl.CostEstimate(
        flops=2 * num_layers * padded_rows * pf * pf,
        transcendentals=0,
        bytes_accessed=(2 * padded_rows * pf * itemsize
                        + w_slab.size * jnp.dtype(w_slab.dtype).itemsize
                        + b_slab.size * jnp.dtype(b_slab.dtype).itemsize),
    )

    out = pl.pallas_call(
        autoencoder_kernel,
        out_shape=jax.ShapeDtypeStruct((padded_rows, pf), x.dtype),
        grid=grid,
        in_specs=[
            # Streamed activations: one batch tile per grid step.
            pl.BlockSpec((tm, pf), lambda i: (i, 0)),
            # Packed weights / biases: constant block index -> VMEM-resident.
            pl.BlockSpec((num_layers, pf, pf), lambda i: (0, 0, 0)),
            pl.BlockSpec((num_layers, 1, pf), lambda i: (0, 0, 0)),
        ],
        out_specs=pl.BlockSpec((tm, pf), lambda i: (i, 0)),
        compiler_params=pltpu.CompilerParams(
            # Batch tiles are independent -> shard across v7x's two TCs.
            dimension_semantics=("parallel",),
        ),
        cost_estimate=cost,
    )(xp, w_slab, b_slab)

    # --- undo row/pack padding -------------------------------------------
    out = out[:rows].reshape(rows * pack, num_input)[:batch]
    return out


def autoencoder_reference(x, params):
    """Pure-JAX reference for correctness checking."""
    h = x
    for w, b in params:
        h = jnp.maximum(jnp.dot(h, w) + b, 0.0)
    return h


# --------------------------------------------------------------------------
# Self-test
# --------------------------------------------------------------------------
if __name__ == "__main__":
    num_input = 64   # sizes: 64 -> 48 -> 32 -> 21 -> 16 -> 21 -> 32 -> 48 -> 64
    key = jax.random.PRNGKey(0)
    key, kp = jax.random.split(key)
    params = init_params(kp, num_input)

    pack = _default_pack(num_input)   # 2 on v5e and older, 4 on v6e / v7x

    # f32 slabs (exact match to the reference).
    w_slab_f32, b_slab = pack_params(params, num_input, pack=pack,
                                     weight_dtype=jnp.float32)
    # bf16 weight slab (v6e/v7x MXU path); bias/accumulation stay f32.
    w_slab_bf16, _ = pack_params(params, num_input, pack=pack,
                                 weight_dtype=jnp.bfloat16)

    # Main test: batch large enough to exercise the batch grid (>= 2 tiles).
    key, kx = jax.random.split(key)
    x = jax.random.normal(kx, (256, num_input), jnp.float32)
    out = jax.block_until_ready(autoencoder_forward(x, w_slab_f32, b_slab))
    ref = autoencoder_reference(x, params)
    assert out.shape == x.shape
    assert jnp.allclose(out, ref, atol=1e-5, rtol=1e-5)

    # Small / ragged batches (exercise pack padding + tile clamping).
    for small_batch in (8, 50, 255):
        key, kx = jax.random.split(key)
        xs = jax.random.normal(kx, (small_batch, num_input), jnp.float32)
        outs = jax.block_until_ready(autoencoder_forward(xs, w_slab_f32, b_slab))
        refs = autoencoder_reference(xs, params)
        assert outs.shape == xs.shape
        assert jnp.allclose(outs, refs, atol=1e-5, rtol=1e-5)

    # bf16-weight path (looser tolerance: bf16 matmul inputs, f32 accumulate).
    out_bf16 = jax.block_until_ready(autoencoder_forward(x, w_slab_bf16, b_slab))
    assert jnp.allclose(out_bf16, ref, atol=5e-2, rtol=5e-2)

    print("KERNEL_OK")
</pallas_src>

<mosaic_0001>
module attributes {stable_mosaic.version = 11 : i64} {
  func.func @autoencoder_kernel(%arg0: i32, %arg1: memref<32x256xf32, #tpu.memory_space<vmem>>, %arg2: memref<8x256x256xf32, #tpu.memory_space<vmem>>, %arg3: memref<8x1x256xf32, #tpu.memory_space<vmem>>, %arg4: memref<32x256xf32, #tpu.memory_space<vmem>>) attributes {dimension_semantics = [#tpu.dimension_semantics<parallel>], iteration_bounds = array<i64: 2>, scalar_prefetch = 0 : i64, scratch_operands = 0 : i64, tpu.core_type = #tpu.core_type<tc>, window_params = [{transform_indices = @transform_0, window_bounds = array<i64: 32, 256>}, {pipeline_mode = #tpu.pipeline_mode<synchronous>, transform_indices = @transform_1, window_bounds = array<i64: 8, 256, 256>}, {pipeline_mode = #tpu.pipeline_mode<synchronous>, transform_indices = @transform_2, window_bounds = array<i64: 8, 1, 256>}, {transform_indices = @transform_3, window_bounds = array<i64: 32, 256>}]} {
    %c0 = arith.constant 0 : index
    %c0_0 = arith.constant 0 : index
    %0 = vector.load %arg1[%c0, %c0_0] : memref<32x256xf32, #tpu.memory_space<vmem>>, vector<32x256xf32>
    %c0_1 = arith.constant 0 : index
    %c0_2 = arith.constant 0 : index
    %c0_3 = arith.constant 0 : index
    %1 = vector.load %arg2[%c0_1, %c0_2, %c0_3] : memref<8x256x256xf32, #tpu.memory_space<vmem>>, vector<1x256x256xf32>
    %2 = vector.shape_cast %1 : vector<1x256x256xf32> to vector<256x256xf32>
    %cst = arith.constant dense<0.000000e+00> : vector<32x256xf32>
    %3 = tpu.matmul %0, %2, %cst {dimension_numbers = #tpu.dot_dimension_numbers<[1], [0], [0], [1], [0, 0, 1, 1], [], []>} : vector<32x256xf32>, vector<256x256xf32>, vector<32x256xf32> -> vector<32x256xf32>
    %c0_4 = arith.constant 0 : index
    %c0_5 = arith.constant 0 : index
    %c0_6 = arith.constant 0 : index
    %4 = vector.load %arg3[%c0_4, %c0_5, %c0_6] : memref<8x1x256xf32, #tpu.memory_space<vmem>>, vector<1x1x256xf32>
    %5 = vector.shape_cast %4 : vector<1x1x256xf32> to vector<1x256xf32>
    %6 = vector.broadcast %5 : vector<1x256xf32> to vector<32x256xf32>
    %7 = arith.addf %3, %6 : vector<32x256xf32>
    %cst_7 = arith.constant 0.000000e+00 : f32
    %8 = vector.broadcast %cst_7 : f32 to vector<32x256xf32>
    %9 = arith.maximumf %7, %8 : vector<32x256xf32>
    %c1 = arith.constant 1 : index
    %c0_8 = arith.constant 0 : index
    %c0_9 = arith.constant 0 : index
    %10 = vector.load %arg2[%c1, %c0_8, %c0_9] : memref<8x256x256xf32, #tpu.memory_space<vmem>>, vector<1x256x256xf32>
    %11 = vector.shape_cast %10 : vector<1x256x256xf32> to vector<256x256xf32>
    %cst_10 = arith.constant dense<0.000000e+00> : vector<32x256xf32>
    %12 = tpu.matmul %9, %11, %cst_10 {dimension_numbers = #tpu.dot_dimension_numbers<[1], [0], [0], [1], [0, 0, 1, 1], [], []>} : vector<32x256xf32>, vector<256x256xf32>, vector<32x256xf32> -> vector<32x256xf32>
    %c1_11 = arith.constant 1 : index
    %c0_12 = arith.constant 0 : index
    %c0_13 = arith.constant 0 : index
    %13 = vector.load %arg3[%c1_11, %c0_12, %c0_13] : memref<8x1x256xf32, #tpu.memory_space<vmem>>, vector<1x1x256xf32>
    %14 = vector.shape_cast %13 : vector<1x1x256xf32> to vector<1x256xf32>
    %15 = vector.broadcast %14 : vector<1x256xf32> to vector<32x256xf32>
    %16 = arith.addf %12, %15 : vector<32x256xf32>
    %cst_14 = arith.constant 0.000000e+00 : f32
    %17 = vector.broadcast %cst_14 : f32 to vector<32x256xf32>
    %18 = arith.maximumf %16, %17 : vector<32x256xf32>
    %c2 = arith.constant 2 : index
    %c0_15 = arith.constant 0 : index
    %c0_16 = arith.constant 0 : index
    %19 = vector.load %arg2[%c2, %c0_15, %c0_16] : memref<8x256x256xf32, #tpu.memory_space<vmem>>, vector<1x256x256xf32>
    %20 = vector.shape_cast %19 : vector<1x256x256xf32> to vector<256x256xf32>
    %cst_17 = arith.constant dense<0.000000e+00> : vector<32x256xf32>
    %21 = tpu.matmul %18, %20, %cst_17 {dimension_numbers = #tpu.dot_dimension_numbers<[1], [0], [0], [1], [0, 0, 1, 1], [], []>} : vector<32x256xf32>, vector<256x256xf32>, vector<32x256xf32> -> vector<32x256xf32>
    %c2_18 = arith.constant 2 : index
    %c0_19 = arith.constant 0 : index
    %c0_20 = arith.constant 0 : index
    %22 = vector.load %arg3[%c2_18, %c0_19, %c0_20] : memref<8x1x256xf32, #tpu.memory_space<vmem>>, vector<1x1x256xf32>
    %23 = vector.shape_cast %22 : vector<1x1x256xf32> to vector<1x256xf32>
    %24 = vector.broadcast %23 : vector<1x256xf32> to vector<32x256xf32>
    %25 = arith.addf %21, %24 : vector<32x256xf32>
    %cst_21 = arith.constant 0.000000e+00 : f32
    %26 = vector.broadcast %cst_21 : f32 to vector<32x256xf32>
    %27 = arith.maximumf %25, %26 : vector<32x256xf32>
    %c3 = arith.constant 3 : index
    %c0_22 = arith.constant 0 : index
    %c0_23 = arith.constant 0 : index
    %28 = vector.load %arg2[%c3, %c0_22, %c0_23] : memref<8x256x256xf32, #tpu.memory_space<vmem>>, vector<1x256x256xf32>
    %29 = vector.shape_cast %28 : vector<1x256x256xf32> to vector<256x256xf32>
    %cst_24 = arith.constant dense<0.000000e+00> : vector<32x256xf32>
    %30 = tpu.matmul %27, %29, %cst_24 {dimension_numbers = #tpu.dot_dimension_numbers<[1], [0], [0], [1], [0, 0, 1, 1], [], []>} : vector<32x256xf32>, vector<256x256xf32>, vector<32x256xf32> -> vector<32x256xf32>
    %c3_25 = arith.constant 3 : index
    %c0_26 = arith.constant 0 : index
    %c0_27 = arith.constant 0 : index
    %31 = vector.load %arg3[%c3_25, %c0_26, %c0_27] : memref<8x1x256xf32, #tpu.memory_space<vmem>>, vector<1x1x256xf32>
    %32 = vector.shape_cast %31 : vector<1x1x256xf32> to vector<1x256xf32>
    %33 = vector.broadcast %32 : vector<1x256xf32> to vector<32x256xf32>
    %34 = arith.addf %30, %33 : vector<32x256xf32>
    %cst_28 = arith.constant 0.000000e+00 : f32
    %35 = vector.broadcast %cst_28 : f32 to vector<32x256xf32>
    %36 = arith.maximumf %34, %35 : vector<32x256xf32>
    %c4 = arith.constant 4 : index
    %c0_29 = arith.constant 0 : index
    %c0_30 = arith.constant 0 : index
    %37 = vector.load %arg2[%c4, %c0_29, %c0_30] : memref<8x256x256xf32, #tpu.memory_space<vmem>>, vector<1x256x256xf32>
    %38 = vector.shape_cast %37 : vector<1x256x256xf32> to vector<256x256xf32>
    %cst_31 = arith.constant dense<0.000000e+00> : vector<32x256xf32>
    %39 = tpu.matmul %36, %38, %cst_31 {dimension_numbers = #tpu.dot_dimension_numbers<[1], [0], [0], [1], [0, 0, 1, 1], [], []>} : vector<32x256xf32>, vector<256x256xf32>, vector<32x256xf32> -> vector<32x256xf32>
    %c4_32 = arith.constant 4 : index
    %c0_33 = arith.constant 0 : index
    %c0_34 = arith.constant 0 : index
    %40 = vector.load %arg3[%c4_32, %c0_33, %c0_34] : memref<8x1x256xf32, #tpu.memory_space<vmem>>, vector<1x1x256xf32>
    %41 = vector.shape_cast %40 : vector<1x1x256xf32> to vector<1x256xf32>
    %42 = vector.broadcast %41 : vector<1x256xf32> to vector<32x256xf32>
    %43 = arith.addf %39, %42 : vector<32x256xf32>
    %cst_35 = arith.constant 0.000000e+00 : f32
    %44 = vector.broadcast %cst_35 : f32 to vector<32x256xf32>
    %45 = arith.maximumf %43, %44 : vector<32x256xf32>
    %c5 = arith.constant 5 : index
    %c0_36 = arith.constant 0 : index
    %c0_37 = arith.constant 0 : index
    %46 = vector.load %arg2[%c5, %c0_36, %c0_37] : memref<8x256x256xf32, #tpu.memory_space<vmem>>, vector<1x256x256xf32>
    %47 = vector.shape_cast %46 : vector<1x256x256xf32> to vector<256x256xf32>
    %cst_38 = arith.constant dense<0.000000e+00> : vector<32x256xf32>
    %48 = tpu.matmul %45, %47, %cst_38 {dimension_numbers = #tpu.dot_dimension_numbers<[1], [0], [0], [1], [0, 0, 1, 1], [], []>} : vector<32x256xf32>, vector<256x256xf32>, vector<32x256xf32> -> vector<32x256xf32>
    %c5_39 = arith.constant 5 : index
    %c0_40 = arith.constant 0 : index
    %c0_41 = arith.constant 0 : index
    %49 = vector.load %arg3[%c5_39, %c0_40, %c0_41] : memref<8x1x256xf32, #tpu.memory_space<vmem>>, vector<1x1x256xf32>
    %50 = vector.shape_cast %49 : vector<1x1x256xf32> to vector<1x256xf32>
    %51 = vector.broadcast %50 : vector<1x256xf32> to vector<32x256xf32>
    %52 = arith.addf %48, %51 : vector<32x256xf32>
    %cst_42 = arith.constant 0.000000e+00 : f32
    %53 = vector.broadcast %cst_42 : f32 to vector<32x256xf32>
    %54 = arith.maximumf %52, %53 : vector<32x256xf32>
    %c6 = arith.constant 6 : index
    %c0_43 = arith.constant 0 : index
    %c0_44 = arith.constant 0 : index
    %55 = vector.load %arg2[%c6, %c0_43, %c0_44] : memref<8x256x256xf32, #tpu.memory_space<vmem>>, vector<1x256x256xf32>
    %56 = vector.shape_cast %55 : vector<1x256x256xf32> to vector<256x256xf32>
    %cst_45 = arith.constant dense<0.000000e+00> : vector<32x256xf32>
    %57 = tpu.matmul %54, %56, %cst_45 {dimension_numbers = #tpu.dot_dimension_numbers<[1], [0], [0], [1], [0, 0, 1, 1], [], []>} : vector<32x256xf32>, vector<256x256xf32>, vector<32x256xf32> -> vector<32x256xf32>
    %c6_46 = arith.constant 6 : index
    %c0_47 = arith.constant 0 : index
    %c0_48 = arith.constant 0 : index
    %58 = vector.load %arg3[%c6_46, %c0_47, %c0_48] : memref<8x1x256xf32, #tpu.memory_space<vmem>>, vector<1x1x256xf32>
    %59 = vector.shape_cast %58 : vector<1x1x256xf32> to vector<1x256xf32>
    %60 = vector.broadcast %59 : vector<1x256xf32> to vector<32x256xf32>
    %61 = arith.addf %57, %60 : vector<32x256xf32>
    %cst_49 = arith.constant 0.000000e+00 : f32
    %62 = vector.broadcast %cst_49 : f32 to vector<32x256xf32>
    %63 = arith.maximumf %61, %62 : vector<32x256xf32>
    %c7 = arith.constant 7 : index
    %c0_50 = arith.constant 0 : index
    %c0_51 = arith.constant 0 : index
    %64 = vector.load %arg2[%c7, %c0_50, %c0_51] : memref<8x256x256xf32, #tpu.memory_space<vmem>>, vector<1x256x256xf32>
    %65 = vector.shape_cast %64 : vector<1x256x256xf32> to vector<256x256xf32>
    %cst_52 = arith.constant dense<0.000000e+00> : vector<32x256xf32>
    %66 = tpu.matmul %63, %65, %cst_52 {dimension_numbers = #tpu.dot_dimension_numbers<[1], [0], [0], [1], [0, 0, 1, 1], [], []>} : vector<32x256xf32>, vector<256x256xf32>, vector<32x256xf32> -> vector<32x256xf32>
    %c7_53 = arith.constant 7 : index
    %c0_54 = arith.constant 0 : index
    %c0_55 = arith.constant 0 : index
    %67 = vector.load %arg3[%c7_53, %c0_54, %c0_55] : memref<8x1x256xf32, #tpu.memory_space<vmem>>, vector<1x1x256xf32>
    %68 = vector.shape_cast %67 : vector<1x1x256xf32> to vector<1x256xf32>
    %69 = vector.broadcast %68 : vector<1x256xf32> to vector<32x256xf32>
    %70 = arith.addf %66, %69 : vector<32x256xf32>
    %cst_56 = arith.constant 0.000000e+00 : f32
    %71 = vector.broadcast %cst_56 : f32 to vector<32x256xf32>
    %72 = arith.maximumf %70, %71 : vector<32x256xf32>
    %c0_57 = arith.constant 0 : index
    %c0_58 = arith.constant 0 : index
    %73 = vector.load %arg4[%c0_57, %c0_58] : memref<32x256xf32, #tpu.memory_space<vmem>>, vector<32x256xf32>
    tpu.vector_store %arg4[%c0_57, %c0_58], %72 {strides = array<i32>} : memref<32x256xf32, #tpu.memory_space<vmem>>, vector<32x256xf32>,
    return
  }
  func.func @transform_0(%arg0: i32) -> (i32, i32) {
    %c0_i32 = arith.constant 0 : i32
    %c0_i32_0 = arith.constant 0 : i32
    return %arg0, %c0_i32 : i32, i32
  }
  func.func @transform_1(%arg0: i32) -> (i32, i32, i32) {
    %c0_i32 = arith.constant 0 : i32
    %c0_i32_0 = arith.constant 0 : i32
    %c0_i32_1 = arith.constant 0 : i32
    %c0_i32_2 = arith.constant 0 : i32
    return %c0_i32, %c0_i32_0, %c0_i32_1 : i32, i32, i32
  }
  func.func @transform_2(%arg0: i32) -> (i32, i32, i32) {
    %c0_i32 = arith.constant 0 : i32
    %c0_i32_0 = arith.constant 0 : i32
    %c0_i32_1 = arith.constant 0 : i32
    %c0_i32_2 = arith.constant 0 : i32
    return %c0_i32, %c0_i32_0, %c0_i32_1 : i32, i32, i32
  }
  func.func @transform_3(%arg0: i32) -> (i32, i32) {
    %c0_i32 = arith.constant 0 : i32
    %c0_i32_0 = arith.constant 0 : i32
    return %arg0, %c0_i32 : i32, i32
  }
}

</mosaic_0001>

<bundles_post_ra>
// kernel: tpu_custom_call.1
= control target key start
LH: loop header
LB: loop body
LE: loop exit
PB: predicated region body
PF: predicated region fallthrough
CT: control target
= control target key end

     0   :  { %8 = vsyncpa [#allocation3], 0  ;;  %s2813_s0 = inlined_call_operand.hbm [shape: f32[64,256], index: 0, kind: input, shape index: {}]   ;;  %s2814_s1 = inlined_call_operand.hbm [shape: f32[8,256,256], index: 1, kind: input, shape index: {}]   ;;  %s2815_s2 = inlined_call_operand.hbm [shape: f32[8,1,256], index: 2, kind: input, shape index: {}]   ;;  %s2816_s3 = inlined_call_operand.hbm [shape: f32[64,256], index: 3, kind: output, shape index: {}]  }
   0x1   :  { %10 = vsyncpa [#allocation3 + $0x1], 0 }
   0x2   :  { %11 = vsyncpa [#allocation6], 0 }
   0x3   :  { %12 = vsyncpa [#allocation4], 0 }
   0x4   :  { %14 = vsyncpa [#allocation4 + $0x1], 0  ;;  %s2539_s12 = smov 0   ;;  %s2541_s13 = smov 0  }
   0x5   :  { %s2543_s14 = smov 0   ;;  %s2545_s15 = smov 0  }
   0x6 LB: > { %s2560_s16 = sadd.s32 4294967295, %s2507_s15   ;;  %s1742_s17 = sadd.s32 4294967294, %s2507_s15   ;;  %s2507_s15 = sphi %s2545_s15, %s2836_s15   ;;  %s2503_s14 = sphi %s2543_s14, %s2835_s14   ;;  %s2499_s13 = sphi %s2541_s13, %s2834_s13   ;;  %s2495_s12 = sphi %s2539_s12, %s2833_s12  }
   0x7   : > { %p40_p0 = scmp.ne.s32.totalorder %s2499_s13, %s2495_s12  ;;  %p2817_p1 = scmp.eq.s32.totalorder %s2560_s16, 0 }
   0x8   : > { %p112_p3 = scmp.eq.s32.totalorder %s1742_s17, 1  ;;  %p1743_p5 = scmp.ge.s32.totalorder %s2507_s15, 1 }
   0x9   : > { %p2569_p4 = por %p2817_p1, %p40_p0  ;;  %p119_p7 = scmp.lt.s32.totalorder %s2507_s15, 3 }
   0xa   : > { %p2574_p6 = por %p112_p3, %p40_p0  ;;  %s2509_s21 = smov [#allocation5]  }
   0xb   : > { %s2820_s18 = scalar_select %p2569_p4, 1, 0 }
   0xc   : > { %s2821_s19 = scalar_select %p2574_p6, 1, 0 }
   0xd   : > { %p2579_p8 = pnand %p1743_p5, %p119_p7  ;;  %s131_s22 = sshll.u32 %s2509_s21, 4  ;;  %s2583_s22 = int_to_ptr.vmem [resolvable:$true] %s131_s22 }
   0xe   : > { %s2510_s24 = smov [#allocation7]   ;;  %s2351_s28 = scalar_lea.hbm %s2814_s1, 65536 }
   0xf   : > { %p2290_p9 = pneg %p2579_p8  ;;  %s144_s25 = sshll.u32 %s2510_s24, 4  ;;  %s2594_s25 = int_to_ptr.vmem [resolvable:$true] %s144_s25 }
  0x10   : > { %p2352_p12 = scmp.ne.s32.totalorder %s2814_s1, %s2351_s28  ;;  %p2358_p5 = scmp.lt.u32.totalorder %s2351_s28, %s2814_s1 }
  0x11   : > { %p2590_p11 = pnand %p2290_p9, %p2817_p1 }
  0x13   : > { %p2353_p13 = pneg %p2590_p11 }
  0x15   : > { %p2354_p0 = pnand %p2353_p13, %p2352_p12 }
  0x17   : > { %p2355_p3 = pneg %p2354_p0 }
  0x19   : > { %p2360_p7 = pnand %p2358_p5, %p2355_p3 }
  0x1b   : > { %2363 = shalt.err (!%p2360_p7)
}
  0x1c   : > { %s2364_s6 = scalar_lea.vmem %s2583_s22, 65536  ;;  %p2372_p2 = scmp.lt.s32.totalorder %s2583_s22, %s2583_s22 }
  0x1d   : > { %p2365_p9 = scmp.ne.s32.totalorder %s2583_s22, %s2364_s6  ;;  %p2373_p12 = scmp.lt.s32.totalorder %s2364_s6, %s2364_s6 }
  0x1f   : > { %p2367_p10 = pnand %p2365_p9, %p2353_p13  ;;  %p2374_p0 = por %p2373_p12, %p2372_p2 }
  0x21   : > { %p2368_p1 = pneg %p2367_p10 }
  0x23   : > { %p2375_p6 = pnand %p2374_p0, %p2368_p1 }
  0x25   : > { %2378 = shalt.err (!%p2375_p6)
}
  0x26   : > { %s2511_s7 = smov 256   ;;  %s2512_s8 = smov 16  }
  0x27   : > { %2293 = dma.hbm_to_vmem [thread:$0]  (!%p2590_p11), %s2814_s1, 65536, %s2583_s22, [#allocation6], %s2511_s7, %s2511_s7, %s2512_s8  }
  0x28   : > { %s2379_s21 = scalar_lea.hbm %s2815_s2, 256 }
  0x29   : > { %p2380_p1 = scmp.ne.s32.totalorder %s2815_s2, %s2379_s21  ;;  %p2386_p10 = scmp.lt.u32.totalorder %s2379_s21, %s2815_s2 }
  0x2b   : > { %p2382_p2 = pnand %p2380_p1, %p2353_p13 }
  0x2d   : > { %p2383_p6 = pneg %p2382_p2 }
  0x2f   : > { %p2388_p3 = pnand %p2386_p10, %p2383_p6 }
  0x31   : > { %2391 = shalt.err (!%p2388_p3)
}
  0x32   : > { %s2392_s22 = scalar_lea.vmem %s2594_s25, 256  ;;  %p2400_p12 = scmp.lt.s32.totalorder %s2594_s25, %s2594_s25 }
  0x33   : > { %p2393_p5 = scmp.ne.s32.totalorder %s2594_s25, %s2392_s22  ;;  %p2401_p0 = scmp.lt.s32.totalorder %s2392_s22, %s2392_s22 }
  0x35   : > { %p2395_p7 = pnand %p2393_p5, %p2353_p13  ;;  %p2402_p1 = por %p2401_p0, %p2400_p12 }
  0x37   : > { %p2396_p9 = pneg %p2395_p7 }
  0x39   : > { %p2403_p2 = pnand %p2402_p1, %p2396_p9 }
  0x3b   : > { %2406 = shalt.err (!%p2403_p2)
}
  0x3c   : > { %s2513_s29 = smov 32   ;;  %s2514_s30 = smov 2  }
  0x3d   : > { %2296 = dma.hbm_to_vmem [thread:$0]  (!%p2590_p11), %s2815_s2, 256, %s2594_s25, [#allocation6], %s2513_s29, %s2513_s29, %s2514_s30  }
  0x3e   : > { %s2652_s6 = sadd.s32 1, %s2507_s15   ;;  %s27_s10 = sadd.s32 1, %s2503_s14 }
  0x3f   : > { %s24_s9 = ssub.s32 %s2507_s15, %s2652_s6  ;;  %p34_p6 = scmp.ne.s32.totalorder %s2503_s14, %s2499_s13 }
  0x40   : > { %p25_p13 = scmp.eq.s32.totalorder %s24_s9, 0  ;;  %p35_p10 = scmp.eq.s32.totalorder %s2507_s15, 0 }
  0x41   : > { %p2824_p5 = scmp.eq.s32.totalorder %s2560_s16, 1  ;;  %p2307_p9 = scmp.lt.s32.totalorder %s2507_s15, 2 }
  0x42   : > { %s2661_s11 = scalar_select %p25_p13, %s2503_s14, %s27_s10  }
  0x43   : > { %p36_p3 = por %p35_p10, %p34_p6  ;;  %p2665_p7 = por %p2824_p5, %p34_p6 }
  0x44   : > { %s158_s23 = sand.u32 1, %s2503_s14   ;;  %s1763_s25 = sshll.u32 %s2507_s15, 10 }
  0x45   : > { %s2825_s17 = scalar_select %p2665_p7, 1, 0 }
  0x46   : > { %s1747_s21 = sshll.u32 %s158_s23, 6  ;;  %s2675_s27 = scalar_lea.hbm %s2813_s0, %s1763_s25 }
  0x47   : > { %s162_s28 = scalar_lea.vmem [#allocation2], %s1747_s21  ;;  %p2679_p11 = pnand %p2307_p9, %p36_p3 }
  0x48   : > { %s170_s22 = sshll.u32 %s162_s28, 4  ;;  %s2683_s30 = scalar_lea.sflag [#allocation3], %s158_s23  ;;  %s2677_s22 = int_to_ptr.vmem [resolvable:$true] %s170_s22 }
  0x49   : > { %s2407_s4 = scalar_lea.hbm %s2675_s27, 1024  ;;  %p2409_p0 = pneg %p2679_p11 }
  0x4a   : > { %p2408_p12 = scmp.ne.s32.totalorder %s2675_s27, %s2407_s4  ;;  %s2412_s10 = scalar_lea.hbm %s2813_s0, 2048 }
  0x4b   : > { %p2413_p13 = scmp.lt.u32.totalorder %s2675_s27, %s2813_s0  ;;  %p2414_p6 = scmp.lt.u32.totalorder %s2412_s10, %s2407_s4 }
  0x4c   : > { %p2410_p1 = pnand %p2409_p0, %p2408_p12  ;;  %p2416_p3 = scmp.lt.u32.totalorder %s2407_s4, %s2675_s27 }
  0x4d   : > { %p2415_p10 = por %p2414_p6, %p2413_p13 }
  0x4e   : > { %p2411_p2 = pneg %p2410_p1 }
  0x4f   : > { %p2417_p5 = por %p2416_p3, %p2415_p10 }
  0x51   : > { %p2418_p9 = pnand %p2417_p5, %p2411_p2 }
  0x53   : > { %2421 = shalt.err (!%p2418_p9)
}
  0x54   : > { %s2422_s23 = scalar_lea.vmem %s2677_s22, 1024  ;;  %s2515_s24 = smov [#allocation2]  }
  0x55   : > { %p2423_p12 = scmp.ne.s32.totalorder %s2677_s22, %s2422_s23  ;;  %s2427_s26 = sshll.u32 %s2515_s24, 4  ;;  %s2428_s26 = int_to_ptr.vmem [resolvable:$false] %s2427_s26 }
  0x56   : > { %s2429_s28 = scalar_lea.vmem %s2428_s26, 2048  ;;  %p2430_p4 = scmp.lt.s32.totalorder %s2677_s22, %s2428_s26 }
  0x57   : > { %p2425_p1 = pnand %p2423_p12, %p2409_p0  ;;  %p2431_p13 = scmp.lt.s32.totalorder %s2429_s28, %s2422_s23 }
  0x59   : > { %p2426_p7 = pneg %p2425_p1  ;;  %p2432_p6 = por %p2431_p13, %p2430_p4 }
  0x5b   : > { %p2433_p10 = pnand %p2432_p6, %p2426_p7 }
  0x5d   : > { %2436 = shalt.err (!%p2433_p10)
}
  0x5e   : > { %2300 = dma.hbm_to_vmem [thread:$0]  (!%p2679_p11), %s2675_s27, 1024, %s2677_s22, %s2683_s30, %s2511_s7, %s2511_s7, %s2512_s8  }
  0x5f   : > { %182 = sbr.rel (%p2579_p8) target bundleno = 1943 (0x797), region = 32  ;;  %s2717_s4 = sand.u32 (!%p2579_p8), 1, %s2499_s13  }
  0x60   : > { %s1752_s5 = sshll.u32 (!%p2579_p8), %s2717_s4, 6  ;;  %s185_s9 = scalar_lea.sflag (!%p2579_p8), [#allocation3], %s2717_s4 }
  0x61   : > { %s2723_s29 = scalar_lea.vmem (!%p2579_p8), [#allocation2], %s1752_s5  ;;  %p2827_p4 = scmp.ne.s32.totalorder (!%p2579_p8), %s2820_s18, 0 }
  0x66   : > { %2482 = dma.done.wait (%p2827_p4), %s185_s9, 1024  }
  0x67   : > { %2484 = vsyncadd (%p2827_p4), %s185_s9, 4294966272  ;;  %p2828_p7 = scmp.eq.s32.totalorder %s2560_s16, 0 }
  0x69   : > { %2486 = dma.done.wait (%p2828_p7), [#allocation6], 65792   ;;  %p2829_p8 = pmov %p2828_p7 }
  0x6a   : > { %v230_v0 = vld [vmem:[#allocation5 + $0x8] sm:$0xff]  ;;  %v232_v1 = vld [vmem:[#allocation5 + $0x18] sm:$0xff]  ;;  %v229_v2 = vld [vmem:[#allocation5] sm:$0xff]  ;;  %s218_s18 = scalar_lea.vmem [#allocation8], %s1752_s5  ;;  %s1765_s7 = sshll.u32 %s2560_s16, 10 }
  0x6b   : > { %2488 = vsyncadd (%p2829_p8), [#allocation6], 4294901504  ;;  %v1766_v3 = vpack.c.bf16 %v232_v1, %v230_v0  ;;  %v231_v4 = vld [vmem:[#allocation5 + $0x10] sm:$0xff]  ;;  %v234_v5 = vld [vmem:[#allocation5 + $0x28] sm:$0xff]  ;;  %s1650_s20 = sshll.u32 %s218_s18, 4  ;;  %s2769_s22 = scalar_lea.hbm %s2816_s3, %s1765_s7  ;;  %s2764_s20 = int_to_ptr.vmem [resolvable:$true] %s1650_s20 }
  0x6c   : > { %v236_v6 = vld [vmem:[#allocation5 + $0x38] sm:$0xff]  ;;  %v1768_v7 = vpack.c.bf16 %v231_v4, %v229_v2  ;;  %v233_v9 = vld [vmem:[#allocation5 + $0x20] sm:$0xff]  ;;  %v235_v10 = vld [vmem:[#allocation5 + $0x30] sm:$0xff]  ;;  %s1636_s16 = scalar_lea.sflag [#allocation4], %s2717_s4  ;;  %s2437_s30 = scalar_lea.vmem %s2764_s20, 1024 }
  0x6d   : > { %v1770_v8 = vpack.c.bf16 %v236_v6, %v234_v5  ;;  %v238_v11 = vld [vmem:[#allocation5 + $0x48] sm:$0xff]  ;;  %1767 = vmatprep.subr.bf16.mxu0 %v1766_v3  ;;  %v240_v12 = vld [vmem:[#allocation5 + $0x58] sm:$0xff]  ;;  %v1772_v13 = vpack.c.bf16 %v235_v10, %v233_v9  ;;  %v237_v15 = vld [vmem:[#allocation5 + $0x40] sm:$0xff]  ;;  %p2438_p11 = scmp.ne.s32.totalorder %s2764_s20, %s2437_s30  ;;  %p2830_p0 = scmp.ne.s32.totalorder %s2825_s17, 0 }
  0x6e   : > { %1769 = vmatpush1.bf16.msra.mxu0 %v1768_v7  ;;  %v1774_v14 = vpack.c.bf16 %v240_v12, %v238_v11  ;;  %v239_v16 = vld [vmem:[#allocation5 + $0x50] sm:$0xff]  ;;  %v242_v17 = vld [vmem:[#allocation5 + $0x68] sm:$0xff]  ;;  %v244_v18 = vld [vmem:[#allocation5 + $0x78] sm:$0xff]  ;;  %s2516_s10 = smov [#allocation8]  }
  0x6f   : > { %1771 = vmatprep.subr.bf16.mxu0 %v1770_v8  ;;  %v1776_v19 = vpack.c.bf16 %v239_v16, %v237_v15  ;;  %v1778_v20 = vpack.c.bf16 %v244_v18, %v242_v17  ;;  %v241_v21 = vld [vmem:[#allocation5 + $0x60] sm:$0xff]  ;;  %v243_v22 = vld [vmem:[#allocation5 + $0x70] sm:$0xff]  ;;  %v246_v23 = vld [vmem:[#allocation5 + $0x88] sm:$0xff]  ;;  %p2439_p2 = pnand %p2438_p11, %p2830_p0  ;;  %s2441_s21 = sshll.u32 %s2516_s10, 4  ;;  %s2442_s21 = int_to_ptr.vmem [resolvable:$false] %s2441_s21 }
  0x70   : > { %v248_v24 = vld [vmem:[#allocation5 + $0x98] sm:$0xff]  ;;  %v1780_v25 = vpack.c.bf16 %v243_v22, %v241_v21  ;;  %v245_v27 = vld [vmem:[#allocation5 + $0x80] sm:$0xff]  ;;  %v247_v28 = vld [vmem:[#allocation5 + $0x90] sm:$0xff]  ;;  %s2443_s25 = scalar_lea.vmem %s2442_s21, 2048  ;;  %p2444_p5 = scmp.lt.s32.totalorder %s2764_s20, %s2442_s21 }
  0x71   : > { %v1782_v26 = vpack.c.bf16 %v248_v24, %v246_v23  ;;  %v250_v29 = vld [vmem:[#allocation5 + $0xa8] sm:$0xff]  ;;  %v252_v30 = vld [vmem:[#allocation5 + $0xb8] sm:$0xff]  ;;  %v1784_v31 = vpack.c.bf16 %v247_v28, %v245_v27  ;;  %v249_v33 = vld [vmem:[#allocation5 + $0xa0] sm:$0xff]  ;;  %p2440_p3 = pneg %p2439_p2  ;;  %p2445_p9 = scmp.lt.s32.totalorder %s2443_s25, %s2437_s30 }
  0x72   : > { %1773 = vmatpush1.bf16.msra.mxu0 %v1772_v13  ;;  %v1786_v32 = vpack.c.bf16 %v252_v30, %v250_v29  ;;  %v251_v34 = vld [vmem:[#allocation5 + $0xb0] sm:$0xff]  ;;  %v254_v35 = vld [vmem:[#allocation5 + $0xc8] sm:$0xff]  ;;  %v256_v36 = vld [vmem:[#allocation5 + $0xd8] sm:$0xff] }
  0x73   : > { %1775 = vmatprep.subr.bf16.mxu0 %v1774_v14  ;;  %v1788_v37 = vpack.c.bf16 %v251_v34, %v249_v33  ;;  %v1790_v38 = vpack.c.bf16 %v256_v36, %v254_v35  ;;  %v253_v39 = vld [vmem:[#allocation5 + $0xc0] sm:$0xff]  ;;  %v255_v40 = vld [vmem:[#allocation5 + $0xd0] sm:$0xff]  ;;  %v222_v41 = vld [vmem:[%s2723_s29 + $0x8] sm:$0xff]  ;;  %p2446_p12 = por %p2445_p9, %p2444_p5 }
  0x74   : > { %v258_v42 = vld [vmem:[#allocation5 + $0xe8] sm:$0xff]  ;;  %v260_v43 = vld [vmem:[#allocation5 + $0xf8] sm:$0xff]  ;;  %369 = vmatprep.mubr.f32.mxu0 %v222_v41  ;;  %v257_v44 = vld [vmem:[#allocation5 + $0xe0] sm:$0xff]  ;;  %v1792_v46 = vpack.c.bf16 %v255_v40, %v253_v39 }
  0x75   : > { %v259_v45 = vld [vmem:[#allocation5 + $0xf0] sm:$0xff]  ;;  %v262_v47 = vld [vmem:[#allocation5 + $0x108] sm:$0xff]  ;;  %v264_v48 = vld [vmem:[#allocation5 + $0x118] sm:$0xff]  ;;  %v1794_v52 = vpack.c.bf16 %v260_v43, %v258_v42  ;;  %p2447_p1 = pnand %p2446_p12, %p2440_p3 }
  0x76   : > { %1777 = vmatpush1.bf16.msra.mxu0 %v1776_v19  ;;  %v404_v49 = vld [vmem:[#allocation5 + $0x208] sm:$0xff]  ;;  %v406_v50 = vld [vmem:[#allocation5 + $0x218] sm:$0xff]  ;;  %v403_v51 = vld [vmem:[#allocation5 + $0x200] sm:$0xff]  ;;  %v1796_v63 = vpack.c.bf16 %v259_v45, %v257_v44  ;;  %v1798_v3 = vpack.c.bf16 %v264_v48, %v262_v47 }
  0x77   : > { %1779 = vmatprep.subr.bf16.mxu0 %v1778_v20  ;;  %v1830_v53 = vpack.c.bf16 %v406_v50, %v404_v49  ;;  %v405_v54 = vld [vmem:[#allocation5 + $0x210] sm:$0xff]  ;;  %v408_v55 = vld [vmem:[#allocation5 + $0x228] sm:$0xff]  ;;  %v410_v56 = vld [vmem:[#allocation5 + $0x238] sm:$0xff] }
  0x78   : > { %v1832_v57 = vpack.c.bf16 %v405_v54, %v403_v51  ;;  %v1834_v58 = vpack.c.bf16 %v410_v56, %v408_v55  ;;  %v407_v59 = vld [vmem:[#allocation5 + $0x220] sm:$0xff]  ;;  %v409_v60 = vld [vmem:[#allocation5 + $0x230] sm:$0xff]  ;;  %v412_v61 = vld [vmem:[#allocation5 + $0x248] sm:$0xff] }
  0x79   : > { %1831 = vmatprep.subr.bf16.mxu1 %v1830_v53  ;;  %v414_v62 = vld [vmem:[#allocation5 + $0x258] sm:$0xff]  ;;  %v261_v0 = vld [vmem:[#allocation5 + $0x100] sm:$0xff]  ;;  %v263_v1 = vld [vmem:[#allocation5 + $0x110] sm:$0xff]  ;;  %v1836_v2 = vpack.c.bf16 %v409_v60, %v407_v59 }
  0x7a   : > { %1781 = vmatpush1.bf16.msra.mxu0 %v1780_v25  ;;  %1833 = vmatpush1.bf16.msra.mxu1 %v1832_v57  ;;  %v266_v4 = vld [vmem:[#allocation5 + $0x128] sm:$0xff]  ;;  %v1838_v5 = vpack.c.bf16 %v414_v62, %v412_v61  ;;  %v411_v6 = vld [vmem:[#allocation5 + $0x240] sm:$0xff]  ;;  %v413_v7 = vld [vmem:[#allocation5 + $0x250] sm:$0xff]  ;;  %v1800_v11 = vpack.c.bf16 %v263_v1, %v261_v0 }
  0x7b   : > { %1783 = vmatprep.subr.bf16.mxu0 %v1782_v26  ;;  %1835 = vmatprep.subr.bf16.mxu1 %v1834_v58  ;;  %v268_v8 = vld [vmem:[#allocation5 + $0x138] sm:$0xff]  ;;  %v416_v9 = vld [vmem:[#allocation5 + $0x268] sm:$0xff]  ;;  %v265_v12 = vld [vmem:[#allocation5 + $0x120] sm:$0xff]  ;;  %v1840_v14 = vpack.c.bf16 %v413_v7, %v411_v6 }
  0x7c   : > { %v418_v10 = vld [vmem:[#allocation5 + $0x278] sm:$0xff]  ;;  %v267_v13 = vld [vmem:[#allocation5 + $0x130] sm:$0xff]  ;;  %v1802_v15 = vpack.c.bf16 %v268_v8, %v266_v4  ;;  %v270_v16 = vld [vmem:[#allocation5 + $0x148] sm:$0xff] }
  0x7d   : > { %v1842_v17 = vpack.c.bf16 %v418_v10, %v416_v9  ;;  %v415_v18 = vld [vmem:[#allocation5 + $0x260] sm:$0xff]  ;;  %v417_v19 = vld [vmem:[#allocation5 + $0x270] sm:$0xff]  ;;  %v272_v20 = vld [vmem:[#allocation5 + $0x158] sm:$0xff]  ;;  %v1804_v23 = vpack.c.bf16 %v267_v13, %v265_v12 }
  0x7e   : > { %1785 = vmatpush1.bf16.msra.mxu0 %v1784_v31  ;;  %1837 = vmatpush1.bf16.msra.mxu1 %v1836_v2  ;;  %v420_v21 = vld [vmem:[#allocation5 + $0x288] sm:$0xff]  ;;  %v422_v22 = vld [vmem:[#allocation5 + $0x298] sm:$0xff]  ;;  %v269_v24 = vld [vmem:[#allocation5 + $0x140] sm:$0xff]  ;;  %v1844_v26 = vpack.c.bf16 %v417_v19, %v415_v18  ;;  %v1806_v27 = vpack.c.bf16 %v272_v20, %v270_v16 }
  0x7f   : > { %1787 = vmatprep.subr.bf16.mxu0 %v1786_v32  ;;  %1839 = vmatprep.subr.bf16.mxu1 %v1838_v5  ;;  %v271_v25 = vld [vmem:[#allocation5 + $0x150] sm:$0xff]  ;;  %v274_v28 = vld [vmem:[#allocation5 + $0x168] sm:$0xff]  ;;  %v1846_v29 = vpack.c.bf16 %v422_v22, %v420_v21  ;;  %v419_v30 = vld [vmem:[#allocation5 + $0x280] sm:$0xff] }
  0x80   : > { %v421_v31 = vld [vmem:[#allocation5 + $0x290] sm:$0xff]  ;;  %v276_v32 = vld [vmem:[#allocation5 + $0x178] sm:$0xff]  ;;  %v424_v33 = vld [vmem:[#allocation5 + $0x2a8] sm:$0xff]  ;;  %v1808_v35 = vpack.c.bf16 %v271_v25, %v269_v24 }
  0x81   : > { %v426_v34 = vld [vmem:[#allocation5 + $0x2b8] sm:$0xff]  ;;  %v273_v36 = vld [vmem:[#allocation5 + $0x160] sm:$0xff]  ;;  %v1810_v39 = vpack.c.bf16 %v276_v32, %v274_v28  ;;  %v278_v40 = vld [vmem:[#allocation5 + $0x188] sm:$0xff] }
  0x82   : > { %1789 = vmatpush1.bf16.msra.mxu0 %v1788_v37  ;;  %1841 = vmatpush1.bf16.msra.mxu1 %v1840_v14  ;;  %v275_v37 = vld [vmem:[#allocation5 + $0x170] sm:$0xff]  ;;  %v1850_v41 = vpack.c.bf16 %v426_v34, %v424_v33  ;;  %v423_v42 = vld [vmem:[#allocation5 + $0x2a0] sm:$0xff]  ;;  %v280_v44 = vld [vmem:[#allocation5 + $0x198] sm:$0xff] }
  0x83   : > { %1791 = vmatprep.subr.bf16.mxu0 %v1790_v38  ;;  %1843 = vmatprep.subr.bf16.mxu1 %v1842_v17  ;;  %v1848_v38 = vpack.c.bf16 %v421_v31, %v419_v30  ;;  %v425_v43 = vld [vmem:[#allocation5 + $0x2b0] sm:$0xff]  ;;  %v428_v45 = vld [vmem:[#allocation5 + $0x2c8] sm:$0xff]  ;;  %v1812_v47 = vpack.c.bf16 %v275_v37, %v273_v36  ;;  %v277_v48 = vld [vmem:[#allocation5 + $0x180] sm:$0xff]  ;;  %v1814_v51 = vpack.c.bf16 %v280_v44, %v278_v40 }
  0x84   : > { %v279_v49 = vld [vmem:[#allocation5 + $0x190] sm:$0xff]  ;;  %v1852_v50 = vpack.c.bf16 %v425_v43, %v423_v42  ;;  %v427_v54 = vld [vmem:[#allocation5 + $0x2c0] sm:$0xff]  ;;  %v284_v56 = vld [vmem:[#allocation5 + $0x1b8] sm:$0xff] }
  0x85   : > { %v429_v55 = vld [vmem:[#allocation5 + $0x2d0] sm:$0xff]  ;;  %v432_v57 = vld [vmem:[#allocation5 + $0x2e8] sm:$0xff]  ;;  %v434_v58 = vld [vmem:[#allocation5 + $0x2f8] sm:$0xff]  ;;  %v1816_v59 = vpack.c.bf16 %v279_v49, %v277_v48 }
  0x86   : > { %1793 = vmatpush1.bf16.msra.mxu0 %v1792_v46  ;;  %1845 = vmatpush1.bf16.msra.mxu1 %v1844_v26  ;;  %v430_v46 = vld [vmem:[#allocation5 + $0x2d8] sm:$0xff]  ;;  %v281_v60 = vld [vmem:[#allocation5 + $0x1a0] sm:$0xff]  ;;  %v283_v61 = vld [vmem:[#allocation5 + $0x1b0] sm:$0xff]  ;;  %v1856_v62 = vpack.c.bf16 %v429_v55, %v427_v54  ;;  %v1858_v1 = vpack.c.bf16 %v434_v58, %v432_v57 }
  0x87   : > { %1795 = vmatprep.subr.bf16.mxu0 %v1794_v52  ;;  %1847 = vmatprep.subr.bf16.mxu1 %v1846_v29  ;;  %v282_v52 = vld [vmem:[#allocation5 + $0x1a8] sm:$0xff]  ;;  %v1854_v53 = vpack.c.bf16 %v430_v46, %v428_v45  ;;  %v431_v2 = vld [vmem:[#allocation5 + $0x2e0] sm:$0xff]  ;;  %v288_v4 = vld [vmem:[#allocation5 + $0x1d8] sm:$0xff]  ;;  %v1820_v7 = vpack.c.bf16 %v283_v61, %v281_v60 }
  0x88   : > { %v286_v0 = vld [vmem:[#allocation5 + $0x1c8] sm:$0xff]  ;;  %v438_v6 = vld [vmem:[#allocation5 + $0x318] sm:$0xff]  ;;  %v285_v8 = vld [vmem:[#allocation5 + $0x1c0] sm:$0xff] }
  0x89   : > { %v436_v5 = vld [vmem:[#allocation5 + $0x308] sm:$0xff]  ;;  %v287_v9 = vld [vmem:[#allocation5 + $0x1d0] sm:$0xff]  ;;  %v435_v14 = vld [vmem:[#allocation5 + $0x300] sm:$0xff] }
  0x8a   : > { %1797 = vmatpush1.bf16.msra.mxu0 %v1796_v63  ;;  %1849 = vmatpush1.bf16.msra.mxu1 %v1848_v38  ;;  %v1818_v63 = vpack.c.bf16 %v284_v56, %v282_v52  ;;  %v290_v12 = vld [vmem:[#allocation5 + $0x1e8] sm:$0xff]  ;;  %v1862_v13 = vpack.c.bf16 %v438_v6, %v436_v5  ;;  %v292_v16 = vld [vmem:[#allocation5 + $0x1f8] sm:$0xff]  ;;  %v1824_v19 = vpack.c.bf16 %v287_v9, %v285_v8  ;;  %v289_v20 = vld [vmem:[#allocation5 + $0x1e0] sm:$0xff] }
  0x8b   : > { %1799 = vmatprep.subr.bf16.mxu0 %v1798_v3  ;;  %1851 = vmatprep.subr.bf16.mxu1 %v1850_v41  ;;  %v433_v3 = vld [vmem:[#allocation5 + $0x2f0] sm:$0xff]  ;;  %v440_v17 = vld [vmem:[#allocation5 + $0x328] sm:$0xff]  ;;  %v442_v18 = vld [vmem:[#allocation5 + $0x338] sm:$0xff]  ;;  %v1826_v22 = vpack.c.bf16 %v292_v16, %v290_v12 }
  0x8c   : > { %v1860_v10 = vpack.c.bf16 %v433_v3, %v431_v2  ;;  %v1866_v24 = vpack.c.bf16 %v442_v18, %v440_v17  ;;  %v439_v25 = vld [vmem:[#allocation5 + $0x320] sm:$0xff]  ;;  %v441_v26 = vld [vmem:[#allocation5 + $0x330] sm:$0xff]  ;;  %v446_v28 = vld [vmem:[#allocation5 + $0x358] sm:$0xff] }
  0x8d   : > { %v1868_v30 = vpack.c.bf16 %v441_v26, %v439_v25  ;;  %v443_v32 = vld [vmem:[#allocation5 + $0x340] sm:$0xff]  ;;  %v445_v33 = vld [vmem:[#allocation5 + $0x350] sm:$0xff]  ;;  %v448_v34 = vld [vmem:[#allocation5 + $0x368] sm:$0xff] }
  0x8e   : > { %1801 = vmatpush1.bf16.msra.mxu0 %v1800_v11  ;;  %1853 = vmatpush1.bf16.msra.mxu1 %v1852_v50  ;;  %v1822_v11 = vpack.c.bf16 %v288_v4, %v286_v0  ;;  %v221_v36 = vld [vmem:[%s2723_s29] sm:$0xff]  ;;  %v1872_v37 = vpack.c.bf16 %v445_v33, %v443_v32  ;;  %v224_v38 = vld [vmem:[%s2723_s29 + $0x18] sm:$0xff]  ;;  %v449_v41 = vld [vmem:[#allocation5 + $0x370] sm:$0xff] }
  0x8f   : > { %1803 = vmatprep.subr.bf16.mxu0 %v1802_v15  ;;  %1855 = vmatprep.subr.bf16.mxu1 %v1854_v53  ;;  %v437_v15 = vld [vmem:[#allocation5 + $0x310] sm:$0xff]  ;;  %v447_v40 = vld [vmem:[#allocation5 + $0x360] sm:$0xff]  ;;  %v452_v42 = vld [vmem:[#allocation5 + $0x388] sm:$0xff] }
  0x90   : > { %v1864_v21 = vpack.c.bf16 %v437_v15, %v435_v14  ;;  %v454_v43 = vld [vmem:[#allocation5 + $0x398] sm:$0xff]  ;;  %v223_v44 = vld [vmem:[%s2723_s29 + $0x10] sm:$0xff]  ;;  %v1876_v45 = vpack.c.bf16 %v449_v41, %v447_v40  ;;  %v226_v46 = vld [vmem:[%s2723_s29 + $0x28] sm:$0xff] }
  0x91   : > { %v451_v48 = vld [vmem:[#allocation5 + $0x380] sm:$0xff]  ;;  %v453_v49 = vld [vmem:[#allocation5 + $0x390] sm:$0xff]  ;;  %v456_v50 = vld [vmem:[#allocation5 + $0x3a8] sm:$0xff] }
  0x92   : > { %1805 = vmatpush1.bf16.msra.mxu0 %v1804_v23  ;;  %1857 = vmatpush1.bf16.msra.mxu1 %v1856_v62  ;;  %v291_v23 = vld [vmem:[#allocation5 + $0x1f0] sm:$0xff]  ;;  %v225_v52 = vld [vmem:[%s2723_s29 + $0x20] sm:$0xff]  ;;  %v1880_v53 = vpack.c.bf16 %v453_v49, %v451_v48  ;;  %v228_v54 = vld [vmem:[%s2723_s29 + $0x38] sm:$0xff] }
  0x93   : > { %1807 = vmatprep.subr.bf16.mxu0 %v1806_v27  ;;  %1859 = vmatprep.subr.bf16.mxu1 %v1858_v1  ;;  %v444_v27 = vld [vmem:[#allocation5 + $0x348] sm:$0xff]  ;;  %v1828_v29 = vpack.c.bf16 %v291_v23, %v289_v20  ;;  %v455_v56 = vld [vmem:[#allocation5 + $0x3a0] sm:$0xff]  ;;  %v457_v57 = vld [vmem:[#allocation5 + $0x3b0] sm:$0xff] }
  0x94   : > { %v1870_v31 = vpack.c.bf16 %v446_v28, %v444_v27  ;;  %v460_v58 = vld [vmem:[#allocation5 + $0x3c8] sm:$0xff]  ;;  %v227_v60 = vld [vmem:[%s2723_s29 + $0x30] sm:$0xff]  ;;  %v1884_v61 = vpack.c.bf16 %v457_v57, %v455_v56  ;;  %v466_v3 = vld [vmem:[#allocation5 + $0x3f8] sm:$0xff] }
  0x95   : > { %v461_v0 = vld [vmem:[#allocation5 + $0x3d0] sm:$0xff]  ;;  %v464_v2 = vld [vmem:[#allocation5 + $0x3e8] sm:$0xff]  ;;  %v463_v5 = vld [vmem:[#allocation5 + $0x3e0] sm:$0xff] }
  0x96   : > { %1809 = vmatpush1.bf16.msra.mxu0 %v1808_v35  ;;  %1861 = vmatpush1.bf16.msra.mxu1 %v1860_v10  ;;  %v450_v35 = vld [vmem:[#allocation5 + $0x378] sm:$0xff]  ;;  %v1890_v4 = vpack.c.bf16 %v466_v3, %v464_v2  ;;  %v465_v6 = vld [vmem:[#allocation5 + $0x3f0] sm:$0xff]  ;;  %v579_v8 = vld [vmem:[#allocation5 + $0x408] sm:$0xff] }
  0x97   : > { %1811 = vmatprep.subr.bf16.mxu0 %v1810_v39  ;;  %1863 = vmatprep.subr.bf16.mxu1 %v1862_v13  ;;  %v1874_v39 = vpack.c.bf16 %v450_v35, %v448_v34  ;;  %v581_v9 = vld [vmem:[#allocation5 + $0x418] sm:$0xff]  ;;  %v578_v10 = vld [vmem:[#allocation5 + $0x400] sm:$0xff]  ;;  %v580_v12 = vld [vmem:[#allocation5 + $0x410] sm:$0xff] }
  0x98   : > { %v583_v13 = vld [vmem:[#allocation5 + $0x428] sm:$0xff]  ;;  %v585_v14 = vld [vmem:[#allocation5 + $0x438] sm:$0xff]  ;;  %v1896_v15 = vpack.c.bf16 %v580_v12, %v578_v10  ;;  %v582_v17 = vld [vmem:[#allocation5 + $0x420] sm:$0xff] }
  0x99   : > { %v1898_v16 = vpack.c.bf16 %v585_v14, %v583_v13  ;;  %v584_v18 = vld [vmem:[#allocation5 + $0x430] sm:$0xff]  ;;  %v589_v20 = vld [vmem:[#allocation5 + $0x458] sm:$0xff]  ;;  %v586_v23 = vld [vmem:[#allocation5 + $0x440] sm:$0xff] }
  0x9a   : > { %1813 = vmatpush1.bf16.msra.mxu0 %v1812_v47  ;;  %1865 = vmatpush1.bf16.msra.mxu1 %v1864_v21  ;;  %v1878_v47 = vpack.c.bf16 %v454_v43, %v452_v42  ;;  %v1900_v21 = vpack.c.bf16 %v584_v18, %v582_v17  ;;  %v591_v25 = vld [vmem:[#allocation5 + $0x468] sm:$0xff]  ;;  %v593_v26 = vld [vmem:[#allocation5 + $0x478] sm:$0xff]  ;;  %v594_v35 = vld [vmem:[#allocation5 + $0x480] sm:$0xff] }
  0x9b   : > { %1815 = vmatprep.subr.bf16.mxu0 %v1814_v51  ;;  %1867 = vmatprep.subr.bf16.mxu1 %v1866_v24  ;;  %v458_v51 = vld [vmem:[#allocation5 + $0x3b8] sm:$0xff]  ;;  %v588_v24 = vld [vmem:[#allocation5 + $0x450] sm:$0xff]  ;;  %v1906_v28 = vpack.c.bf16 %v593_v26, %v591_v25  ;;  %v598_v41 = vld [vmem:[#allocation5 + $0x4a0] sm:$0xff] }
  0x9c   : > { %v1882_v55 = vpack.c.bf16 %v458_v51, %v456_v50  ;;  %v1904_v27 = vpack.c.bf16 %v588_v24, %v586_v23  ;;  %v597_v32 = vld [vmem:[#allocation5 + $0x498] sm:$0xff]  ;;  %v600_v42 = vld [vmem:[#allocation5 + $0x4b0] sm:$0xff]  ;;  %v603_v43 = vld [vmem:[#allocation5 + $0x4c8] sm:$0xff] }
  0x9d   : > { %v604_v48 = vld [vmem:[#allocation5 + $0x4d0] sm:$0xff]  ;;  %v607_v49 = vld [vmem:[#allocation5 + $0x4e8] sm:$0xff]  ;;  %v609_v50 = vld [vmem:[#allocation5 + $0x4f8] sm:$0xff] }
  0x9e   : > { %1817 = vmatpush1.bf16.msra.mxu0 %v1816_v59  ;;  %1869 = vmatpush1.bf16.msra.mxu1 %v1868_v30  ;;  %v462_v59 = vld [vmem:[#allocation5 + $0x3d8] sm:$0xff]  ;;  %v592_v30 = vld [vmem:[#allocation5 + $0x470] sm:$0xff]  ;;  %v619_v3 = vld [vmem:[#allocation5 + $0x548] sm:$0xff] }
  0x9f   : > { %1819 = vmatprep.subr.bf16.mxu0 %v1818_v63  ;;  %1871 = vmatprep.subr.bf16.mxu1 %v1870_v31  ;;  %v1886_v62 = vpack.c.bf16 %v462_v59, %v460_v58  ;;  %v459_v63 = vld [vmem:[#allocation5 + $0x3c0] sm:$0xff]  ;;  %v595_v31 = vld [vmem:[#allocation5 + $0x488] sm:$0xff]  ;;  %v613_v56 = vld [vmem:[#allocation5 + $0x518] sm:$0xff] }
  0xa0   : > { %v1888_v1 = vpack.c.bf16 %v461_v0, %v459_v63  ;;  %v1910_v34 = vpack.c.bf16 %v597_v32, %v595_v31  ;;  %v610_v59 = vld [vmem:[#allocation5 + $0x500] sm:$0xff]  ;;  %v616_v2 = vld [vmem:[#allocation5 + $0x530] sm:$0xff]  ;;  %v625_v10 = vld [vmem:[#allocation5 + $0x578] sm:$0xff]  ;;  %v295_v31 = vlaneseq }
  0xa1   : > { %v622_v13 = vld [vmem:[#allocation5 + $0x560] sm:$0xff]  ;;  %v624_v14 = vld [vmem:[#allocation5 + $0x570] sm:$0xff] }
  0xa2   : > { %1821 = vmatpush1.bf16.msra.mxu0 %v1820_v7  ;;  %1873 = vmatpush1.bf16.msra.mxu1 %v1872_v37  ;;  %v1892_v7 = vpack.c.bf16 %v465_v6, %v463_v5  ;;  %v599_v37 = vld [vmem:[#allocation5 + $0x4a8] sm:$0xff]  ;;  %v1940_v17 = vpack.c.bf16 %v624_v14, %v622_v13  ;;  %v630_v25 = vld [vmem:[#allocation5 + $0x5a0] sm:$0xff]  ;;  %v632_v26 = vld [vmem:[#allocation5 + $0x5b0] sm:$0xff]  ;;  %v296_v32 = vshrl.u32 %v295_v31, 7 }
  0xa3   : > { %1823 = vmatprep.subr.bf16.mxu0 %v1822_v11  ;;  %1875 = vmatprep.subr.bf16.mxu1 %v1874_v39  ;;  %v1894_v11 = vpack.c.bf16 %v581_v9, %v579_v8  ;;  %v620_v8 = vld [vmem:[#allocation5 + $0x550] sm:$0xff]  ;;  %v623_v9 = vld [vmem:[#allocation5 + $0x568] sm:$0xff]  ;;  %v760_v13 = vld [vmem:[#allocation5 + $0x638] sm:$0xff] }
  0xa4   : > { %v1938_v12 = vpack.c.bf16 %v625_v10, %v623_v9  ;;  %v753_v9 = vld [vmem:[#allocation5 + $0x600] sm:$0xff]  ;;  %v772_v31 = vld [vmem:[#allocation5 + $0x698] sm:$0xff] }
  0xa6   : > { %1825 = vmatpush1.bf16.msra.mxu0 %v1824_v19  ;;  %1877 = vmatpush1.bf16.msra.mxu1 %v1876_v45  ;;  %v587_v19 = vld [vmem:[#allocation5 + $0x448] sm:$0xff]  ;;  %v1916_v45 = vpack.c.bf16 %v600_v42, %v598_v41 }
  0xa7   : > { %1827 = vmatprep.subr.bf16.mxu0 %v1826_v22  ;;  %1879 = vmatprep.subr.bf16.mxu1 %v1878_v47  ;;  %v1902_v22 = vpack.c.bf16 %v589_v20, %v587_v19  ;;  %v602_v47 = vld [vmem:[#allocation5 + $0x4c0] sm:$0xff]  ;;  %v628_v20 = vld [vmem:[#allocation5 + $0x590] sm:$0xff] }
  0xa8   : > { %v1920_v51 = vpack.c.bf16 %v604_v48, %v602_v47  ;;  %v626_v19 = vld [vmem:[#allocation5 + $0x580] sm:$0xff] }
  0xa9   : > { %v1944_v23 = vpack.c.bf16 %v628_v20, %v626_v19  ;;  %v764_v19 = vld [vmem:[#allocation5 + $0x658] sm:$0xff] }
  0xaa   : > { %1829 = vmatpush1.bf16.msra.mxu0 %v1828_v29  ;;  %1881 = vmatpush1.bf16.msra.mxu1 %v1880_v53  ;;  %v590_v29 = vld [vmem:[#allocation5 + $0x460] sm:$0xff] }
  0xab   : > { %1883 = vmatprep.subr.bf16.mxu1 %v1882_v55  ;;  %1895 = vmatprep.subr.bf16.mxu0 %v1894_v11  ;;  %v1908_v33 = vpack.c.bf16 %v592_v30, %v590_v29  ;;  %v606_v53 = vld [vmem:[#allocation5 + $0x4e0] sm:$0xff]  ;;  %v611_v55 = vld [vmem:[#allocation5 + $0x508] sm:$0xff]  ;;  %v1948_v29 = vpack.c.bf16 %v632_v26, %v630_v25  ;;  %v768_v25 = vld [vmem:[#allocation5 + $0x678] sm:$0xff] }
  0xac   : > { %v1926_v58 = vpack.c.bf16 %v613_v56, %v611_v55 }
  0xad   : > { %370 = vmatmul.mubr.f32.vlgmr.msra.gmra.mrb[0].mxu0 %v221_v36  ;;  %v596_v36 = vld [vmem:[#allocation5 + $0x490] sm:$0xff] }
  0xae   : > { %375 = vmatprep.mubr.f32.mxu0 %v224_v38  ;;  %1885 = vmatpush1.bf16.msra.mxu1 %v1884_v61  ;;  %v601_v38 = vld [vmem:[#allocation5 + $0x4b8] sm:$0xff]  ;;  %v1912_v39 = vpack.c.bf16 %v596_v36, %v594_v35  ;;  %v615_v61 = vld [vmem:[#allocation5 + $0x528] sm:$0xff]  ;;  %v2743_v35 = vsub.s32 1, %v296_v32 }
  0xaf   : > { %1887 = vmatprep.subr.bf16.mxu1 %v1886_v62  ;;  %1897 = vmatpush1.bf16.msra.mxu0 %v1896_v15  ;;  %v1914_v40 = vpack.c.bf16 %v601_v38, %v599_v37  ;;  %v617_v62 = vld [vmem:[#allocation5 + $0x538] sm:$0xff]  ;;  %v627_v15 = vld [vmem:[#allocation5 + $0x588] sm:$0xff] }
  0xb0   : > { %1899 = vmatprep.subr.bf16.mxu0 %v1898_v16  ;;  %v1930_v0 = vpack.c.bf16 %v617_v62, %v615_v61  ;;  %v629_v16 = vld [vmem:[#allocation5 + $0x598] sm:$0xff]  ;;  %v634_v62 = vld [vmem:[#allocation5 + $0x5c0] sm:$0xff] }
  0xb1   : > { %376 = vmatmul.mubr.f32.gmra.mrb[2].mxu0 %v223_v44  ;;  %v605_v44 = vld [vmem:[#allocation5 + $0x4d8] sm:$0xff]  ;;  %v1942_v18 = vpack.c.bf16 %v629_v16, %v627_v15  ;;  %v757_v16 = vld [vmem:[#allocation5 + $0x620] sm:$0xff] }
  0xb2   : > { %381 = vmatprep.mubr.f32.mxu0 %v226_v46  ;;  %1889 = vmatpush1.bf16.msra.mxu1 %v1888_v1  ;;  %v1918_v46 = vpack.c.bf16 %v605_v44, %v603_v43  ;;  %v614_v1 = vld [vmem:[#allocation5 + $0x520] sm:$0xff] }
  0xb3   : > { %1891 = vmatprep.subr.bf16.mxu1 %v1890_v4  ;;  %1901 = vmatpush1.bf16.msra.mxu0 %v1900_v21  ;;  %v621_v4 = vld [vmem:[#allocation5 + $0x558] sm:$0xff]  ;;  %v1932_v5 = vpack.c.bf16 %v616_v2, %v614_v1  ;;  %v631_v21 = vld [vmem:[#allocation5 + $0x5a8] sm:$0xff] }
  0xb4   : > { %1903 = vmatprep.subr.bf16.mxu0 %v1902_v22  ;;  %v1934_v6 = vpack.c.bf16 %v621_v4, %v619_v3  ;;  %v633_v22 = vld [vmem:[#allocation5 + $0x5b8] sm:$0xff]  ;;  %v639_v1 = vld [vmem:[#allocation5 + $0x5e8] sm:$0xff]  ;;  %v638_v4 = vld [vmem:[#allocation5 + $0x5e0] sm:$0xff] }
  0xb5   : > { %382 = vmatmul.mubr.f32.gmra.mrb[4].mxu0 %v225_v52  ;;  %v1922_v52 = vpack.c.bf16 %v609_v50, %v607_v49  ;;  %v1946_v24 = vpack.c.bf16 %v633_v22, %v631_v21  ;;  %v641_v2 = vld [vmem:[#allocation5 + $0x5f8] sm:$0xff]  ;;  %v761_v22 = vld [vmem:[#allocation5 + $0x640] sm:$0xff] }
  0xb6   : > { %387 = vmatprep.mubr.f32.mxu0 %v228_v54  ;;  %1893 = vmatpush1.bf16.msra.mxu1 %v1892_v7  ;;  %v608_v54 = vld [vmem:[#allocation5 + $0x4f0] sm:$0xff]  ;;  %v618_v7 = vld [vmem:[#allocation5 + $0x540] sm:$0xff]  ;;  %v1954_v3 = vpack.c.bf16 %v641_v2, %v639_v1 }
  0xb7   : > { %1905 = vmatpush1.bf16.msra.mxu0 %v1904_v27  ;;  %v1924_v57 = vpack.c.bf16 %v608_v54, %v606_v53  ;;  %v1936_v11 = vpack.c.bf16 %v620_v8, %v618_v7  ;;  %v635_v27 = vld [vmem:[#allocation5 + $0x5c8] sm:$0xff]  ;;  %v756_v8 = vld [vmem:[#allocation5 + $0x618] sm:$0xff]  ;;  %v789_v2 = vld [vmem:[#allocation5 + $0x720] sm:$0xff] }
  0xb8   : > { %1907 = vmatprep.subr.bf16.mxu0 %v1906_v28  ;;  %v637_v28 = vld [vmem:[#allocation5 + $0x5d8] sm:$0xff]  ;;  %v754_v7 = vld [vmem:[#allocation5 + $0x608] sm:$0xff] }
  0xb9   : > { %388 = vmatmul.mubr.f32.gmra.mrb[6].mxu0 %v227_v60  ;;  %v612_v60 = vld [vmem:[#allocation5 + $0x510] sm:$0xff]  ;;  %v1950_v30 = vpack.c.bf16 %v637_v28, %v635_v27  ;;  %v1958_v10 = vpack.c.bf16 %v756_v8, %v754_v7  ;;  %v765_v28 = vld [vmem:[#allocation5 + $0x660] sm:$0xff] }
  0xba   : > { %v1928_v63 = vpack.c.bf16 %v612_v60, %v610_v59  ;;  %v793_v8 = vld [vmem:[#allocation5 + $0x740] sm:$0xff] }
  0xbb   : > { %1909 = vmatpush1.bf16.msra.mxu0 %v1908_v33  ;;  %v2741_v33 = vsub.s32 0, %v296_v32  ;;  %1959 = vmatprep.subr.bf16.mxu1 %v1958_v10  ;;  %v798_v10 = vld [vmem:[#allocation5 + $0x768] sm:$0xff] }
  0xbc   : > { %1911 = vmatprep.subr.bf16.mxu0 %v1910_v34  ;;  %v293_v34 = vld [vmem:[#allocation7] sm:$0x3] }
  0xbd   : > { %v298_v36 = vrot.slane %v293_v34, %v2741_v33  ;;  %v302_v37 = vrot.slane %v293_v34, %v2743_v35 }
  0xbf   : > { %1913 = vmatpush1.bf16.msra.mxu0 %v1912_v39 }
  0xc0   : > { %1915 = vmatprep.subr.bf16.mxu0 %v1914_v40 }
  0xc3   : > { %1917 = vmatpush1.bf16.msra.mxu0 %v1916_v45 }
  0xc4   : > { %1919 = vmatprep.subr.bf16.mxu0 %v1918_v46 }
  0xc7   : > { %1921 = vmatpush1.bf16.msra.mxu0 %v1920_v51 }
  0xc8   : > { %1923 = vmatprep.subr.bf16.mxu0 %v1922_v52 }
  0xcb   : > { %1925 = vmatpush1.bf16.msra.mxu0 %v1924_v57 }
  0xcc   : > { %1927 = vmatprep.subr.bf16.mxu0 %v1926_v58 }
  0xcf   : > { %1929 = vmatpush1.bf16.msra.mxu0 %v1928_v63  ;;  %v636_v63 = vld [vmem:[#allocation5 + $0x5d0] sm:$0xff] }
  0xd0   : > { %1931 = vmatprep.subr.bf16.mxu0 %v1930_v0  ;;  %v1952_v0 = vpack.c.bf16 %v636_v63, %v634_v62  ;;  %v790_v62 = vld [vmem:[#allocation5 + $0x728] sm:$0xff]  ;;  %v792_v63 = vld [vmem:[#allocation5 + $0x738] sm:$0xff] }
  0xd1   : > { %v1994_v1 = vpack.c.bf16 %v792_v63, %v790_v62  ;;  %v811_v62 = vld [vmem:[#allocation5 + $0x7d0] sm:$0xff] }
  0xd3   : > { %1933 = vmatpush1.bf16.msra.mxu0 %v1932_v5  ;;  %v640_v5 = vld [vmem:[#allocation5 + $0x5f0] sm:$0xff] }
  0xd4   : > { %1935 = vmatprep.subr.bf16.mxu0 %v1934_v6  ;;  %v1956_v6 = vpack.c.bf16 %v640_v5, %v638_v4  ;;  %v794_v4 = vld [vmem:[#allocation5 + $0x748] sm:$0xff]  ;;  %v796_v5 = vld [vmem:[#allocation5 + $0x758] sm:$0xff] }
  0xd5   : > { %v1998_v7 = vpack.c.bf16 %v796_v5, %v794_v4  ;;  %v815_v4 = vld [vmem:[#allocation5 + $0x7f0] sm:$0xff] }
  0xd7   : > { %1937 = vmatpush1.bf16.msra.mxu0 %v1936_v11  ;;  %v755_v11 = vld [vmem:[#allocation5 + $0x610] sm:$0xff] }
  0xd8   : > { %1939 = vmatprep.subr.bf16.mxu0 %v1938_v12  ;;  %v758_v12 = vld [vmem:[#allocation5 + $0x628] sm:$0xff]  ;;  %v1960_v14 = vpack.c.bf16 %v755_v11, %v753_v9  ;;  %v795_v9 = vld [vmem:[#allocation5 + $0x750] sm:$0xff]  ;;  %v800_v11 = vld [vmem:[#allocation5 + $0x778] sm:$0xff] }
  0xd9   : > { %v1962_v15 = vpack.c.bf16 %v760_v13, %v758_v12  ;;  %v2000_v12 = vpack.c.bf16 %v795_v9, %v793_v8  ;;  %v2002_v13 = vpack.c.bf16 %v800_v11, %v798_v10  ;;  %v928_v8 = vld [vmem:[#allocation5 + $0x800] sm:$0xff]  ;;  %v930_v10 = vld [vmem:[#allocation5 + $0x810] sm:$0xff]  ;;  %v933_v11 = vld [vmem:[#allocation5 + $0x828] sm:$0xff] }
  0xdb   : > { %1941 = vmatpush1.bf16.msra.mxu0 %v1940_v17  ;;  %v759_v17 = vld [vmem:[#allocation5 + $0x630] sm:$0xff] }
  0xdc   : > { %1943 = vmatprep.subr.bf16.mxu0 %v1942_v18  ;;  %v762_v18 = vld [vmem:[#allocation5 + $0x648] sm:$0xff]  ;;  %v1964_v20 = vpack.c.bf16 %v759_v17, %v757_v16  ;;  %v804_v17 = vld [vmem:[#allocation5 + $0x798] sm:$0xff] }
  0xdd   : > { %v1966_v21 = vpack.c.bf16 %v764_v19, %v762_v18  ;;  %v802_v16 = vld [vmem:[#allocation5 + $0x788] sm:$0xff] }
  0xde   : > { %v2006_v19 = vpack.c.bf16 %v804_v17, %v802_v16  ;;  %v934_v16 = vld [vmem:[#allocation5 + $0x830] sm:$0xff]  ;;  %v937_v17 = vld [vmem:[#allocation5 + $0x848] sm:$0xff] }
  0xdf   : > { %1945 = vmatpush1.bf16.msra.mxu0 %v1944_v23  ;;  %v763_v23 = vld [vmem:[#allocation5 + $0x650] sm:$0xff] }
  0xe0   : > { %1947 = vmatprep.subr.bf16.mxu0 %v1946_v24  ;;  %v766_v24 = vld [vmem:[#allocation5 + $0x668] sm:$0xff]  ;;  %v1968_v26 = vpack.c.bf16 %v763_v23, %v761_v22  ;;  %v808_v23 = vld [vmem:[#allocation5 + $0x7b8] sm:$0xff] }
  0xe1   : > { %v1970_v27 = vpack.c.bf16 %v768_v25, %v766_v24  ;;  %v806_v22 = vld [vmem:[#allocation5 + $0x7a8] sm:$0xff] }
  0xe2   : > { %v2010_v25 = vpack.c.bf16 %v808_v23, %v806_v22  ;;  %v938_v22 = vld [vmem:[#allocation5 + $0x850] sm:$0xff]  ;;  %v941_v23 = vld [vmem:[#allocation5 + $0x868] sm:$0xff] }
  0xe3   : > { %1949 = vmatpush1.bf16.msra.mxu0 %v1948_v29  ;;  %v767_v29 = vld [vmem:[#allocation5 + $0x670] sm:$0xff] }
  0xe4   : > { %1951 = vmatprep.subr.bf16.mxu0 %v1950_v30  ;;  %v770_v30 = vld [vmem:[#allocation5 + $0x688] sm:$0xff]  ;;  %v1972_v32 = vpack.c.bf16 %v767_v29, %v765_v28  ;;  %v812_v29 = vld [vmem:[#allocation5 + $0x7d8] sm:$0xff] }
  0xe5   : > { %v1974_v34 = vpack.c.bf16 %v772_v31, %v770_v30  ;;  %v810_v28 = vld [vmem:[#allocation5 + $0x7c8] sm:$0xff] }
  0xe6   : > { %v2014_v31 = vpack.c.bf16 %v812_v29, %v810_v28  ;;  %v942_v28 = vld [vmem:[#allocation5 + $0x870] sm:$0xff]  ;;  %v945_v29 = vld [vmem:[#allocation5 + $0x888] sm:$0xff] }
  0xe7   : > { %1953 = vmatpush1.bf16.msra.mxu0 %v1952_v0 }
  0xe8   : > { %1955 = vmatprep.subr.bf16.mxu0 %v1954_v3  ;;  %v791_v3 = vld [vmem:[#allocation5 + $0x730] sm:$0xff] }
  0xeb   : > { %1957 = vmatpush1.bf16.msra.mxu0 %v1956_v6  ;;  %v1996_v6 = vpack.c.bf16 %v791_v3, %v789_v2  ;;  %v813_v3 = vld [vmem:[#allocation5 + $0x7e0] sm:$0xff] }
  0xec   : > { %v2020_v5 = vpack.c.bf16 %v815_v4, %v813_v3  ;;  %v969_v3 = vld [vmem:[#allocation5 + $0x948] sm:$0xff]  ;;  %v971_v4 = vld [vmem:[#allocation5 + $0x958] sm:$0xff] }
 0x180   : > { %v371_v38 = vpop.f32.mrb[0].mxu0 }
 0x181   : > { %v372_v39 = vadd.f32 %v371_v38, %v298_v36  ;;  %v373_v40 = vpop.f32.mrb[1].mxu0  ;;  %v774_v38 = vld [vmem:[#allocation5 + $0x6a8] sm:$0xff] }
 0x182   : > { %v374_v41 = vadd.f32 %v373_v40, %v302_v37 }
 0x183   : > { %v394_v44 = vmax.f32 %v372_v39, 0.0  ;;  %v776_v39 = vld [vmem:[#allocation5 + $0x6b8] sm:$0xff] }
 0x184   : > { %v377_v42 = vpop.f32.mrb[2].mxu0  ;;  %v395_v43 = vmax.f32 %v374_v41, 0.0  ;;  %v1978_v41 = vpack.c.bf16 %v776_v39, %v774_v38 }
 0x185   : > { %v378_v45 = vadd.f32 %v377_v42, %v298_v36  ;;  %v379_v46 = vpop.f32.mrb[3].mxu0  ;;  %v773_v42 = vld [vmem:[#allocation5 + $0x6a0] sm:$0xff] }
 0x186   : > { %v380_v47 = vadd.f32 %v379_v46, %v302_v37  ;;  %544 = vmatprep.mubr.f32.mxu1 %v395_v43  ;;  %v775_v43 = vld [vmem:[#allocation5 + $0x6b0] sm:$0xff] }
 0x187   : > { %545 = vmatmul.mubr.f32.vlgmr.msra.gmra.mrb[0].mxu1 %v394_v44  ;;  %v396_v50 = vmax.f32 %v378_v45, 0.0  ;;  %v778_v44 = vld [vmem:[#allocation5 + $0x6c8] sm:$0xff]  ;;  %v780_v45 = vld [vmem:[#allocation5 + $0x6d8] sm:$0xff]  ;;  %v1980_v46 = vpack.c.bf16 %v775_v43, %v773_v42 }
 0x188   : > { %v397_v48 = vmax.f32 %v380_v47, 0.0  ;;  %v383_v49 = vpop.f32.mrb[4].mxu0  ;;  %1961 = vmatpush1.bf16.msra.mxu1 %v1960_v14  ;;  %v1982_v47 = vpack.c.bf16 %v780_v45, %v778_v44  ;;  %v797_v14 = vld [vmem:[#allocation5 + $0x760] sm:$0xff] }
 0x189   : > { %v384_v51 = vadd.f32 %v383_v49, %v298_v36  ;;  %v385_v52 = vpop.f32.mrb[5].mxu0  ;;  %1963 = vmatprep.subr.bf16.mxu1 %v1962_v15  ;;  %v779_v49 = vld [vmem:[#allocation5 + $0x6d0] sm:$0xff] }
 0x18a   : > { %v386_v53 = vadd.f32 %v385_v52, %v302_v37  ;;  %550 = vmatprep.mubr.f32.mxu1 %v397_v48  ;;  %v777_v48 = vld [vmem:[#allocation5 + $0x6c0] sm:$0xff]  ;;  %v799_v15 = vld [vmem:[#allocation5 + $0x770] sm:$0xff] }
 0x18b   : > { %551 = vmatmul.mubr.f32.gmra.mrb[2].mxu1 %v396_v50  ;;  %v398_v56 = vmax.f32 %v384_v51, 0.0  ;;  %v782_v50 = vld [vmem:[#allocation5 + $0x6e8] sm:$0xff]  ;;  %v784_v51 = vld [vmem:[#allocation5 + $0x6f8] sm:$0xff]  ;;  %v1984_v52 = vpack.c.bf16 %v779_v49, %v777_v48  ;;  %v2004_v18 = vpack.c.bf16 %v799_v15, %v797_v14  ;;  %v932_v15 = vld [vmem:[#allocation5 + $0x820] sm:$0xff] }
 0x18c   : > { %v399_v54 = vmax.f32 %v386_v53, 0.0  ;;  %v389_v55 = vpop.f32.mrb[6].mxu0  ;;  %1965 = vmatpush1.bf16.msra.mxu1 %v1964_v20  ;;  %v1986_v53 = vpack.c.bf16 %v784_v51, %v782_v50  ;;  %v801_v20 = vld [vmem:[#allocation5 + $0x780] sm:$0xff] }
 0x18d   : > { %v390_v57 = vadd.f32 %v389_v55, %v298_v36  ;;  %v391_v58 = vpop.f32.mrb[7].mxu0  ;;  %1967 = vmatprep.subr.bf16.mxu1 %v1966_v21  ;;  %v769_v36 = vld [vmem:[#allocation5 + $0x680] sm:$0xff]  ;;  %v783_v55 = vld [vmem:[#allocation5 + $0x6f0] sm:$0xff] }
 0x18e   : > { %v392_v59 = vadd.f32 %v391_v58, %v302_v37  ;;  %556 = vmatprep.mubr.f32.mxu1 %v399_v54  ;;  %v771_v37 = vld [vmem:[#allocation5 + $0x690] sm:$0xff]  ;;  %v781_v54 = vld [vmem:[#allocation5 + $0x6e0] sm:$0xff] }
 0x18f   : > { %557 = vmatmul.mubr.f32.gmra.mrb[4].mxu1 %v398_v56  ;;  %v400_v61 = vmax.f32 %v390_v57, 0.0  ;;  %v1976_v40 = vpack.c.bf16 %v771_v37, %v769_v36  ;;  %v786_v56 = vld [vmem:[#allocation5 + $0x708] sm:$0xff]  ;;  %v788_v57 = vld [vmem:[#allocation5 + $0x718] sm:$0xff]  ;;  %v1988_v58 = vpack.c.bf16 %v783_v55, %v781_v54  ;;  %v803_v21 = vld [vmem:[#allocation5 + $0x790] sm:$0xff] }
 0x190   : > { %v401_v60 = vmax.f32 %v392_v59, 0.0  ;;  %1969 = vmatpush1.bf16.msra.mxu1 %v1968_v26  ;;  %v1990_v59 = vpack.c.bf16 %v788_v57, %v786_v56  ;;  %v2008_v24 = vpack.c.bf16 %v803_v21, %v801_v20  ;;  %v805_v26 = vld [vmem:[#allocation5 + $0x7a0] sm:$0xff] }
 0x191   : > { %1971 = vmatprep.subr.bf16.mxu1 %v1970_v27  ;;  %v807_v27 = vld [vmem:[#allocation5 + $0x7b0] sm:$0xff]  ;;  %v936_v21 = vld [vmem:[#allocation5 + $0x840] sm:$0xff] }
 0x192   : > { %562 = vmatprep.mubr.f32.mxu1 %v401_v60  ;;  %v785_v60 = vld [vmem:[#allocation5 + $0x700] sm:$0xff]  ;;  %v2012_v30 = vpack.c.bf16 %v807_v27, %v805_v26 }
 0x193   : > { %563 = vmatmul.mubr.f32.gmra.mrb[6].mxu1 %v400_v61  ;;  %v787_v61 = vld [vmem:[#allocation5 + $0x710] sm:$0xff]  ;;  %v940_v27 = vld [vmem:[#allocation5 + $0x860] sm:$0xff] }
 0x194   : > { %1973 = vmatpush1.bf16.msra.mxu1 %v1972_v32  ;;  %v1992_v0 = vpack.c.bf16 %v787_v61, %v785_v60  ;;  %v468_v32 = vld [vmem:[#allocation7 + $0x2] sm:$0x3] }
 0x195   : > { %1975 = vmatprep.subr.bf16.mxu1 %v1974_v34  ;;  %v473_v34 = vrot.slane %v468_v32, %v2741_v33  ;;  %v477_v36 = vrot.slane %v468_v32, %v2743_v35  ;;  %v809_v61 = vld [vmem:[#allocation5 + $0x7c0] sm:$0xff] }
 0x196   : > { %v2016_v63 = vpack.c.bf16 %v811_v62, %v809_v61  ;;  %v965_v61 = vld [vmem:[#allocation5 + $0x928] sm:$0xff]  ;;  %v967_v62 = vld [vmem:[#allocation5 + $0x938] sm:$0xff] }
 0x198   : > { %1977 = vmatpush1.bf16.msra.mxu1 %v1976_v40 }
 0x199   : > { %1979 = vmatprep.subr.bf16.mxu1 %v1978_v41 }
 0x19c   : > { %1981 = vmatpush1.bf16.msra.mxu1 %v1980_v46 }
 0x19d   : > { %1983 = vmatprep.subr.bf16.mxu1 %v1982_v47 }
 0x1a0   : > { %1985 = vmatpush1.bf16.msra.mxu1 %v1984_v52 }
 0x1a1   : > { %1987 = vmatprep.subr.bf16.mxu1 %v1986_v53 }
 0x1a4   : > { %1989 = vmatpush1.bf16.msra.mxu1 %v1988_v58 }
 0x1a5   : > { %1991 = vmatprep.subr.bf16.mxu1 %v1990_v59 }
 0x1a8   : > { %1993 = vmatpush1.bf16.msra.mxu1 %v1992_v0  ;;  %v814_v0 = vld [vmem:[#allocation5 + $0x7e8] sm:$0xff] }
 0x1a9   : > { %1995 = vmatprep.subr.bf16.mxu1 %v1994_v1  ;;  %v816_v1 = vld [vmem:[#allocation5 + $0x7f8] sm:$0xff] }
 0x1aa   : > { %v2018_v2 = vpack.c.bf16 %v816_v1, %v814_v0  ;;  %v2058_v0 = vpack.c.bf16 %v967_v62, %v965_v61  ;;  %v964_v1 = vld [vmem:[#allocation5 + $0x920] sm:$0xff]  ;;  %v986_v61 = vld [vmem:[#allocation5 + $0x9d0] sm:$0xff] }
 0x1ac   : > { %1997 = vmatpush1.bf16.msra.mxu1 %v1996_v6  ;;  %v929_v6 = vld [vmem:[#allocation5 + $0x808] sm:$0xff] }
 0x1ad   : > { %1999 = vmatprep.subr.bf16.mxu1 %v1998_v7  ;;  %v931_v7 = vld [vmem:[#allocation5 + $0x818] sm:$0xff] }
 0x1ae   : > { %v2022_v9 = vpack.c.bf16 %v931_v7, %v929_v6  ;;  %v2062_v6 = vpack.c.bf16 %v971_v4, %v969_v3  ;;  %v968_v7 = vld [vmem:[#allocation5 + $0x940] sm:$0xff]  ;;  %v990_v3 = vld [vmem:[#allocation5 + $0x9f0] sm:$0xff] }
 0x1b0   : > { %2001 = vmatpush1.bf16.msra.mxu1 %v2000_v12  ;;  %v935_v12 = vld [vmem:[#allocation5 + $0x838] sm:$0xff]  ;;  %2023 = vmatprep.subr.bf16.mxu0 %v2022_v9  ;;  %v973_v9 = vld [vmem:[#allocation5 + $0x968] sm:$0xff] }
 0x1b1   : > { %2003 = vmatprep.subr.bf16.mxu1 %v2002_v13  ;;  %v2024_v13 = vpack.c.bf16 %v930_v10, %v928_v8  ;;  %v2026_v14 = vpack.c.bf16 %v935_v12, %v933_v11  ;;  %v970_v8 = vld [vmem:[#allocation5 + $0x950] sm:$0xff]  ;;  %v975_v10 = vld [vmem:[#allocation5 + $0x978] sm:$0xff] }
 0x1b2   : > { %v2064_v11 = vpack.c.bf16 %v970_v8, %v968_v7  ;;  %v2066_v12 = vpack.c.bf16 %v975_v10, %v973_v9  ;;  %v1103_v7 = vld [vmem:[#allocation5 + $0xa00] sm:$0xff]  ;;  %v1105_v9 = vld [vmem:[#allocation5 + $0xa10] sm:$0xff]  ;;  %v1108_v10 = vld [vmem:[#allocation5 + $0xa28] sm:$0xff] }
 0x1b4   : > { %2005 = vmatpush1.bf16.msra.mxu1 %v2004_v18  ;;  %v939_v18 = vld [vmem:[#allocation5 + $0x858] sm:$0xff] }
 0x1b5   : > { %2007 = vmatprep.subr.bf16.mxu1 %v2006_v19  ;;  %v2028_v19 = vpack.c.bf16 %v934_v16, %v932_v15  ;;  %v2030_v20 = vpack.c.bf16 %v939_v18, %v937_v17  ;;  %v977_v15 = vld [vmem:[#allocation5 + $0x988] sm:$0xff]  ;;  %v979_v16 = vld [vmem:[#allocation5 + $0x998] sm:$0xff] }
 0x1b6   : > { %v2070_v18 = vpack.c.bf16 %v979_v16, %v977_v15  ;;  %v1109_v15 = vld [vmem:[#allocation5 + $0xa30] sm:$0xff]  ;;  %v1112_v16 = vld [vmem:[#allocation5 + $0xa48] sm:$0xff] }
 0x1b8   : > { %2009 = vmatpush1.bf16.msra.mxu1 %v2008_v24  ;;  %v943_v24 = vld [vmem:[#allocation5 + $0x878] sm:$0xff] }
 0x1b9   : > { %2011 = vmatprep.subr.bf16.mxu1 %v2010_v25  ;;  %v2032_v25 = vpack.c.bf16 %v938_v22, %v936_v21  ;;  %v2034_v26 = vpack.c.bf16 %v943_v24, %v941_v23  ;;  %v981_v21 = vld [vmem:[#allocation5 + $0x9a8] sm:$0xff]  ;;  %v983_v22 = vld [vmem:[#allocation5 + $0x9b8] sm:$0xff] }
 0x1ba   : > { %v2074_v24 = vpack.c.bf16 %v983_v22, %v981_v21  ;;  %v1113_v21 = vld [vmem:[#allocation5 + $0xa50] sm:$0xff]  ;;  %v1116_v22 = vld [vmem:[#allocation5 + $0xa68] sm:$0xff] }
 0x1bc   : > { %2013 = vmatpush1.bf16.msra.mxu1 %v2012_v30  ;;  %v947_v30 = vld [vmem:[#allocation5 + $0x898] sm:$0xff] }
 0x1bd   : > { %2015 = vmatprep.subr.bf16.mxu1 %v2014_v31  ;;  %v2036_v31 = vpack.c.bf16 %v942_v28, %v940_v27  ;;  %v2038_v32 = vpack.c.bf16 %v947_v30, %v945_v29  ;;  %v985_v27 = vld [vmem:[#allocation5 + $0x9c8] sm:$0xff]  ;;  %v987_v28 = vld [vmem:[#allocation5 + $0x9d8] sm:$0xff] }
 0x1be   : > { %v2078_v30 = vpack.c.bf16 %v987_v28, %v985_v27  ;;  %v1117_v27 = vld [vmem:[#allocation5 + $0xa70] sm:$0xff]  ;;  %v1120_v28 = vld [vmem:[#allocation5 + $0xa88] sm:$0xff] }
 0x1c0   : > { %2017 = vmatpush1.bf16.msra.mxu1 %v2016_v63 }
 0x1c1   : > { %2019 = vmatprep.subr.bf16.mxu1 %v2018_v2  ;;  %v966_v2 = vld [vmem:[#allocation5 + $0x930] sm:$0xff] }
 0x1c4   : > { %2021 = vmatpush1.bf16.msra.mxu1 %v2020_v5  ;;  %v2060_v5 = vpack.c.bf16 %v966_v2, %v964_v1  ;;  %v988_v2 = vld [vmem:[#allocation5 + $0x9e0] sm:$0xff] }
 0x1c5   : > { %v2084_v4 = vpack.c.bf16 %v990_v3, %v988_v2  ;;  %v1144_v2 = vld [vmem:[#allocation5 + $0xb48] sm:$0xff]  ;;  %v1146_v3 = vld [vmem:[#allocation5 + $0xb58] sm:$0xff] }
 0x25a   : > { %v546_v37 = vpop.f32.mrb[0].mxu1 }
 0x25b   : > { %v547_v38 = vadd.f32 %v546_v37, %v473_v34  ;;  %v548_v39 = vpop.f32.mrb[1].mxu1  ;;  %v949_v37 = vld [vmem:[#allocation5 + $0x8a8] sm:$0xff] }
 0x25c   : > { %v549_v40 = vadd.f32 %v548_v39, %v477_v36 }
 0x25d   : > { %v569_v43 = vmax.f32 %v547_v38, 0.0  ;;  %v951_v38 = vld [vmem:[#allocation5 + $0x8b8] sm:$0xff] }
 0x25e   : > { %v570_v41 = vmax.f32 %v549_v40, 0.0  ;;  %v552_v42 = vpop.f32.mrb[2].mxu1  ;;  %v2042_v40 = vpack.c.bf16 %v951_v38, %v949_v37 }
 0x25f   : > { %v553_v44 = vadd.f32 %v552_v42, %v473_v34  ;;  %v554_v45 = vpop.f32.mrb[3].mxu1  ;;  %v950_v42 = vld [vmem:[#allocation5 + $0x8b0] sm:$0xff] }
 0x260   : > { %v555_v46 = vadd.f32 %v554_v45, %v477_v36  ;;  %719 = vmatprep.mubr.f32.mxu0 %v570_v41  ;;  %v948_v41 = vld [vmem:[#allocation5 + $0x8a0] sm:$0xff] }
 0x261   : > { %720 = vmatmul.mubr.f32.vlgmr.msra.gmra.mrb[8].mxu0 %v569_v43  ;;  %v571_v49 = vmax.f32 %v553_v44, 0.0  ;;  %v953_v43 = vld [vmem:[#allocation5 + $0x8c8] sm:$0xff]  ;;  %v955_v44 = vld [vmem:[#allocation5 + $0x8d8] sm:$0xff]  ;;  %v2044_v45 = vpack.c.bf16 %v950_v42, %v948_v41 }
 0x262   : > { %v572_v47 = vmax.f32 %v555_v46, 0.0  ;;  %v558_v48 = vpop.f32.mrb[4].mxu1  ;;  %2025 = vmatpush1.bf16.msra.mxu0 %v2024_v13  ;;  %v2046_v46 = vpack.c.bf16 %v955_v44, %v953_v43  ;;  %v972_v13 = vld [vmem:[#allocation5 + $0x960] sm:$0xff] }
 0x263   : > { %v559_v50 = vadd.f32 %v558_v48, %v473_v34  ;;  %v560_v51 = vpop.f32.mrb[5].mxu1  ;;  %2027 = vmatprep.subr.bf16.mxu0 %v2026_v14  ;;  %v954_v48 = vld [vmem:[#allocation5 + $0x8d0] sm:$0xff] }
 0x264   : > { %v561_v52 = vadd.f32 %v560_v51, %v477_v36  ;;  %725 = vmatprep.mubr.f32.mxu0 %v572_v47  ;;  %v952_v47 = vld [vmem:[#allocation5 + $0x8c0] sm:$0xff]  ;;  %v974_v14 = vld [vmem:[#allocation5 + $0x970] sm:$0xff] }
 0x265   : > { %726 = vmatmul.mubr.f32.gmra.mrb[10].mxu0 %v571_v49  ;;  %v573_v55 = vmax.f32 %v559_v50, 0.0  ;;  %v957_v49 = vld [vmem:[#allocation5 + $0x8e8] sm:$0xff]  ;;  %v959_v50 = vld [vmem:[#allocation5 + $0x8f8] sm:$0xff]  ;;  %v2048_v51 = vpack.c.bf16 %v954_v48, %v952_v47  ;;  %v2068_v17 = vpack.c.bf16 %v974_v14, %v972_v13  ;;  %v1107_v14 = vld [vmem:[#allocation5 + $0xa20] sm:$0xff] }
 0x266   : > { %v574_v53 = vmax.f32 %v561_v52, 0.0  ;;  %v564_v54 = vpop.f32.mrb[6].mxu1  ;;  %2029 = vmatpush1.bf16.msra.mxu0 %v2028_v19  ;;  %v2050_v52 = vpack.c.bf16 %v959_v50, %v957_v49  ;;  %v976_v19 = vld [vmem:[#allocation5 + $0x980] sm:$0xff] }
 0x267   : > { %v565_v56 = vadd.f32 %v564_v54, %v473_v34  ;;  %v566_v57 = vpop.f32.mrb[7].mxu1  ;;  %2031 = vmatprep.subr.bf16.mxu0 %v2030_v20  ;;  %v944_v34 = vld [vmem:[#allocation5 + $0x880] sm:$0xff]  ;;  %v958_v54 = vld [vmem:[#allocation5 + $0x8f0] sm:$0xff] }
 0x268   : > { %v567_v58 = vadd.f32 %v566_v57, %v477_v36  ;;  %731 = vmatprep.mubr.f32.mxu0 %v574_v53  ;;  %v946_v36 = vld [vmem:[#allocation5 + $0x890] sm:$0xff]  ;;  %v956_v53 = vld [vmem:[#allocation5 + $0x8e0] sm:$0xff] }
 0x269   : > { %732 = vmatmul.mubr.f32.gmra.mrb[12].mxu0 %v573_v55  ;;  %v575_v60 = vmax.f32 %v565_v56, 0.0  ;;  %v2040_v39 = vpack.c.bf16 %v946_v36, %v944_v34  ;;  %v961_v55 = vld [vmem:[#allocation5 + $0x908] sm:$0xff]  ;;  %v963_v56 = vld [vmem:[#allocation5 + $0x918] sm:$0xff]  ;;  %v2052_v57 = vpack.c.bf16 %v958_v54, %v956_v53  ;;  %v978_v20 = vld [vmem:[#allocation5 + $0x990] sm:$0xff] }
 0x26a   : > { %v576_v59 = vmax.f32 %v567_v58, 0.0  ;;  %2033 = vmatpush1.bf16.msra.mxu0 %v2032_v25  ;;  %v2054_v58 = vpack.c.bf16 %v963_v56, %v961_v55  ;;  %v2072_v23 = vpack.c.bf16 %v978_v20, %v976_v19  ;;  %v980_v25 = vld [vmem:[#allocation5 + $0x9a0] sm:$0xff] }
 0x26b   : > { %2035 = vmatprep.subr.bf16.mxu0 %v2034_v26  ;;  %v982_v26 = vld [vmem:[#allocation5 + $0x9b0] sm:$0xff]  ;;  %v1111_v20 = vld [vmem:[#allocation5 + $0xa40] sm:$0xff] }
 0x26c   : > { %737 = vmatprep.mubr.f32.mxu0 %v576_v59  ;;  %v960_v59 = vld [vmem:[#allocation5 + $0x900] sm:$0xff]  ;;  %v2076_v29 = vpack.c.bf16 %v982_v26, %v980_v25 }
 0x26d   : > { %738 = vmatmul.mubr.f32.gmra.mrb[14].mxu0 %v575_v60  ;;  %v962_v60 = vld [vmem:[#allocation5 + $0x910] sm:$0xff]  ;;  %v1115_v26 = vld [vmem:[#allocation5 + $0xa60] sm:$0xff] }
 0x26e   : > { %2037 = vmatpush1.bf16.msra.mxu0 %v2036_v31  ;;  %v2056_v63 = vpack.c.bf16 %v962_v60, %v960_v59  ;;  %v643_v31 = vld [vmem:[#allocation7 + $0x4] sm:$0x3] }
 0x26f   : > { %2039 = vmatprep.subr.bf16.mxu0 %v2038_v32  ;;  %v648_v32 = vrot.slane %v643_v31, %v2741_v33  ;;  %v652_v34 = vrot.slane %v643_v31, %v2743_v35  ;;  %v984_v60 = vld [vmem:[#allocation5 + $0x9c0] sm:$0xff] }
 0x270   : > { %v2080_v62 = vpack.c.bf16 %v986_v61, %v984_v60  ;;  %v1140_v60 = vld [vmem:[#allocation5 + $0xb28] sm:$0xff]  ;;  %v1142_v61 = vld [vmem:[#allocation5 + $0xb38] sm:$0xff] }
 0x272   : > { %2041 = vmatpush1.bf16.msra.mxu0 %v2040_v39 }
 0x273   : > { %2043 = vmatprep.subr.bf16.mxu0 %v2042_v40 }
 0x276   : > { %2045 = vmatpush1.bf16.msra.mxu0 %v2044_v45 }
 0x277   : > { %2047 = vmatprep.subr.bf16.mxu0 %v2046_v46 }
 0x27a   : > { %2049 = vmatpush1.bf16.msra.mxu0 %v2048_v51 }
 0x27b   : > { %2051 = vmatprep.subr.bf16.mxu0 %v2050_v52 }
 0x27e   : > { %2053 = vmatpush1.bf16.msra.mxu0 %v2052_v57 }
 0x27f   : > { %2055 = vmatprep.subr.bf16.mxu0 %v2054_v58 }
 0x282   : > { %2057 = vmatpush1.bf16.msra.mxu0 %v2056_v63  ;;  %v989_v63 = vld [vmem:[#allocation5 + $0x9e8] sm:$0xff] }
 0x283   : > { %2059 = vmatprep.subr.bf16.mxu0 %v2058_v0  ;;  %v991_v0 = vld [vmem:[#allocation5 + $0x9f8] sm:$0xff] }
 0x284   : > { %v2082_v1 = vpack.c.bf16 %v991_v0, %v989_v63  ;;  %v2122_v63 = vpack.c.bf16 %v1142_v61, %v1140_v60  ;;  %v1139_v0 = vld [vmem:[#allocation5 + $0xb20] sm:$0xff]  ;;  %v1161_v60 = vld [vmem:[#allocation5 + $0xbd0] sm:$0xff] }
 0x286   : > { %2061 = vmatpush1.bf16.msra.mxu0 %v2060_v5  ;;  %v1104_v5 = vld [vmem:[#allocation5 + $0xa08] sm:$0xff] }
 0x287   : > { %2063 = vmatprep.subr.bf16.mxu0 %v2062_v6  ;;  %v1106_v6 = vld [vmem:[#allocation5 + $0xa18] sm:$0xff] }
 0x288   : > { %v2086_v8 = vpack.c.bf16 %v1106_v6, %v1104_v5  ;;  %v2126_v5 = vpack.c.bf16 %v1146_v3, %v1144_v2  ;;  %v1143_v6 = vld [vmem:[#allocation5 + $0xb40] sm:$0xff]  ;;  %v1165_v2 = vld [vmem:[#allocation5 + $0xbf0] sm:$0xff] }
 0x28a   : > { %2065 = vmatpush1.bf16.msra.mxu0 %v2064_v11  ;;  %v1110_v11 = vld [vmem:[#allocation5 + $0xa38] sm:$0xff]  ;;  %2087 = vmatprep.subr.bf16.mxu1 %v2086_v8  ;;  %v1148_v8 = vld [vmem:[#allocation5 + $0xb68] sm:$0xff] }
 0x28b   : > { %2067 = vmatprep.subr.bf16.mxu0 %v2066_v12  ;;  %v2088_v12 = vpack.c.bf16 %v1105_v9, %v1103_v7  ;;  %v2090_v13 = vpack.c.bf16 %v1110_v11, %v1108_v10  ;;  %v1145_v7 = vld [vmem:[#allocation5 + $0xb50] sm:$0xff]  ;;  %v1150_v9 = vld [vmem:[#allocation5 + $0xb78] sm:$0xff] }
 0x28c   : > { %v2128_v10 = vpack.c.bf16 %v1145_v7, %v1143_v6  ;;  %v2130_v11 = vpack.c.bf16 %v1150_v9, %v1148_v8  ;;  %v1278_v6 = vld [vmem:[#allocation5 + $0xc00] sm:$0xff]  ;;  %v1280_v8 = vld [vmem:[#allocation5 + $0xc10] sm:$0xff]  ;;  %v1283_v9 = vld [vmem:[#allocation5 + $0xc28] sm:$0xff] }
 0x28e   : > { %2069 = vmatpush1.bf16.msra.mxu0 %v2068_v17  ;;  %v1114_v17 = vld [vmem:[#allocation5 + $0xa58] sm:$0xff] }
 0x28f   : > { %2071 = vmatprep.subr.bf16.mxu0 %v2070_v18  ;;  %v2092_v18 = vpack.c.bf16 %v1109_v15, %v1107_v14  ;;  %v2094_v19 = vpack.c.bf16 %v1114_v17, %v1112_v16  ;;  %v1152_v14 = vld [vmem:[#allocation5 + $0xb88] sm:$0xff]  ;;  %v1154_v15 = vld [vmem:[#allocation5 + $0xb98] sm:$0xff] }
 0x290   : > { %v2134_v17 = vpack.c.bf16 %v1154_v15, %v1152_v14  ;;  %v1284_v14 = vld [vmem:[#allocation5 + $0xc30] sm:$0xff]  ;;  %v1287_v15 = vld [vmem:[#allocation5 + $0xc48] sm:$0xff] }
 0x292   : > { %2073 = vmatpush1.bf16.msra.mxu0 %v2072_v23  ;;  %v1118_v23 = vld [vmem:[#allocation5 + $0xa78] sm:$0xff] }
 0x293   : > { %2075 = vmatprep.subr.bf16.mxu0 %v2074_v24  ;;  %v2096_v24 = vpack.c.bf16 %v1113_v21, %v1111_v20  ;;  %v2098_v25 = vpack.c.bf16 %v1118_v23, %v1116_v22  ;;  %v1156_v20 = vld [vmem:[#allocation5 + $0xba8] sm:$0xff]  ;;  %v1158_v21 = vld [vmem:[#allocation5 + $0xbb8] sm:$0xff] }
 0x294   : > { %v2138_v23 = vpack.c.bf16 %v1158_v21, %v1156_v20  ;;  %v1288_v20 = vld [vmem:[#allocation5 + $0xc50] sm:$0xff]  ;;  %v1291_v21 = vld [vmem:[#allocation5 + $0xc68] sm:$0xff] }
 0x296   : > { %2077 = vmatpush1.bf16.msra.mxu0 %v2076_v29  ;;  %v1122_v29 = vld [vmem:[#allocation5 + $0xa98] sm:$0xff] }
 0x297   : > { %2079 = vmatprep.subr.bf16.mxu0 %v2078_v30  ;;  %v2100_v30 = vpack.c.bf16 %v1117_v27, %v1115_v26  ;;  %v2102_v31 = vpack.c.bf16 %v1122_v29, %v1120_v28  ;;  %v1160_v26 = vld [vmem:[#allocation5 + $0xbc8] sm:$0xff]  ;;  %v1162_v27 = vld [vmem:[#allocation5 + $0xbd8] sm:$0xff] }
 0x298   : > { %v2142_v29 = vpack.c.bf16 %v1162_v27, %v1160_v26  ;;  %v1292_v26 = vld [vmem:[#allocation5 + $0xc70] sm:$0xff]  ;;  %v1295_v27 = vld [vmem:[#allocation5 + $0xc88] sm:$0xff] }
 0x29a   : > { %2081 = vmatpush1.bf16.msra.mxu0 %v2080_v62 }
 0x29b   : > { %2083 = vmatprep.subr.bf16.mxu0 %v2082_v1  ;;  %v1141_v1 = vld [vmem:[#allocation5 + $0xb30] sm:$0xff] }
 0x29e   : > { %2085 = vmatpush1.bf16.msra.mxu0 %v2084_v4  ;;  %v2124_v4 = vpack.c.bf16 %v1141_v1, %v1139_v0  ;;  %v1163_v1 = vld [vmem:[#allocation5 + $0xbe0] sm:$0xff] }
 0x29f   : > { %v2148_v3 = vpack.c.bf16 %v1165_v2, %v1163_v1  ;;  %v1319_v1 = vld [vmem:[#allocation5 + $0xd48] sm:$0xff]  ;;  %v1321_v2 = vld [vmem:[#allocation5 + $0xd58] sm:$0xff] }
 0x334   : > { %v721_v36 = vpop.f32.mrb[8].mxu0 }
 0x335   : > { %v722_v37 = vadd.f32 %v721_v36, %v648_v32  ;;  %v723_v38 = vpop.f32.mrb[9].mxu0  ;;  %v1124_v36 = vld [vmem:[#allocation5 + $0xaa8] sm:$0xff] }
 0x336   : > { %v724_v39 = vadd.f32 %v723_v38, %v652_v34 }
 0x337   : > { %v744_v42 = vmax.f32 %v722_v37, 0.0  ;;  %v1126_v37 = vld [vmem:[#allocation5 + $0xab8] sm:$0xff] }
 0x338   : > { %v745_v40 = vmax.f32 %v724_v39, 0.0  ;;  %v727_v41 = vpop.f32.mrb[10].mxu0  ;;  %v2106_v39 = vpack.c.bf16 %v1126_v37, %v1124_v36 }
 0x339   : > { %v728_v43 = vadd.f32 %v727_v41, %v648_v32  ;;  %v729_v44 = vpop.f32.mrb[11].mxu0  ;;  %v1125_v41 = vld [vmem:[#allocation5 + $0xab0] sm:$0xff] }
 0x33a   : > { %v730_v45 = vadd.f32 %v729_v44, %v652_v34  ;;  %894 = vmatprep.mubr.f32.mxu1 %v745_v40  ;;  %v1123_v40 = vld [vmem:[#allocation5 + $0xaa0] sm:$0xff] }
 0x33b   : > { %895 = vmatmul.mubr.f32.vlgmr.msra.gmra.mrb[8].mxu1 %v744_v42  ;;  %v746_v48 = vmax.f32 %v728_v43, 0.0  ;;  %v1128_v42 = vld [vmem:[#allocation5 + $0xac8] sm:$0xff]  ;;  %v1130_v43 = vld [vmem:[#allocation5 + $0xad8] sm:$0xff]  ;;  %v2108_v44 = vpack.c.bf16 %v1125_v41, %v1123_v40 }
 0x33c   : > { %v747_v46 = vmax.f32 %v730_v45, 0.0  ;;  %v733_v47 = vpop.f32.mrb[12].mxu0  ;;  %2089 = vmatpush1.bf16.msra.mxu1 %v2088_v12  ;;  %v2110_v45 = vpack.c.bf16 %v1130_v43, %v1128_v42  ;;  %v1147_v12 = vld [vmem:[#allocation5 + $0xb60] sm:$0xff] }
 0x33d   : > { %v734_v49 = vadd.f32 %v733_v47, %v648_v32  ;;  %v735_v50 = vpop.f32.mrb[13].mxu0  ;;  %2091 = vmatprep.subr.bf16.mxu1 %v2090_v13  ;;  %v1129_v47 = vld [vmem:[#allocation5 + $0xad0] sm:$0xff] }
 0x33e   : > { %v736_v51 = vadd.f32 %v735_v50, %v652_v34  ;;  %900 = vmatprep.mubr.f32.mxu1 %v747_v46  ;;  %v1127_v46 = vld [vmem:[#allocation5 + $0xac0] sm:$0xff]  ;;  %v1149_v13 = vld [vmem:[#allocation5 + $0xb70] sm:$0xff] }
 0x33f   : > { %901 = vmatmul.mubr.f32.gmra.mrb[10].mxu1 %v746_v48  ;;  %v748_v54 = vmax.f32 %v734_v49, 0.0  ;;  %v1132_v48 = vld [vmem:[#allocation5 + $0xae8] sm:$0xff]  ;;  %v1134_v49 = vld [vmem:[#allocation5 + $0xaf8] sm:$0xff]  ;;  %v2112_v50 = vpack.c.bf16 %v1129_v47, %v1127_v46  ;;  %v2132_v16 = vpack.c.bf16 %v1149_v13, %v1147_v12  ;;  %v1282_v13 = vld [vmem:[#allocation5 + $0xc20] sm:$0xff] }
 0x340   : > { %v749_v52 = vmax.f32 %v736_v51, 0.0  ;;  %v739_v53 = vpop.f32.mrb[14].mxu0  ;;  %2093 = vmatpush1.bf16.msra.mxu1 %v2092_v18  ;;  %v2114_v51 = vpack.c.bf16 %v1134_v49, %v1132_v48  ;;  %v1151_v18 = vld [vmem:[#allocation5 + $0xb80] sm:$0xff] }
 0x341   : > { %v740_v55 = vadd.f32 %v739_v53, %v648_v32  ;;  %v741_v56 = vpop.f32.mrb[15].mxu0  ;;  %2095 = vmatprep.subr.bf16.mxu1 %v2094_v19  ;;  %v1119_v32 = vld [vmem:[#allocation5 + $0xa80] sm:$0xff]  ;;  %v1133_v53 = vld [vmem:[#allocation5 + $0xaf0] sm:$0xff] }
 0x342   : > { %v742_v57 = vadd.f32 %v741_v56, %v652_v34  ;;  %906 = vmatprep.mubr.f32.mxu1 %v749_v52  ;;  %v1121_v34 = vld [vmem:[#allocation5 + $0xa90] sm:$0xff]  ;;  %v1131_v52 = vld [vmem:[#allocation5 + $0xae0] sm:$0xff] }
 0x343   : > { %907 = vmatmul.mubr.f32.gmra.mrb[12].mxu1 %v748_v54  ;;  %v750_v59 = vmax.f32 %v740_v55, 0.0  ;;  %v2104_v38 = vpack.c.bf16 %v1121_v34, %v1119_v32  ;;  %v1136_v54 = vld [vmem:[#allocation5 + $0xb08] sm:$0xff]  ;;  %v1138_v55 = vld [vmem:[#allocation5 + $0xb18] sm:$0xff]  ;;  %v2116_v56 = vpack.c.bf16 %v1133_v53, %v1131_v52  ;;  %v1153_v19 = vld [vmem:[#allocation5 + $0xb90] sm:$0xff] }
 0x344   : > { %v751_v58 = vmax.f32 %v742_v57, 0.0  ;;  %2097 = vmatpush1.bf16.msra.mxu1 %v2096_v24  ;;  %v2118_v57 = vpack.c.bf16 %v1138_v55, %v1136_v54  ;;  %v2136_v22 = vpack.c.bf16 %v1153_v19, %v1151_v18  ;;  %v1155_v24 = vld [vmem:[#allocation5 + $0xba0] sm:$0xff] }
 0x345   : > { %2099 = vmatprep.subr.bf16.mxu1 %v2098_v25  ;;  %v1157_v25 = vld [vmem:[#allocation5 + $0xbb0] sm:$0xff]  ;;  %v1286_v19 = vld [vmem:[#allocation5 + $0xc40] sm:$0xff] }
 0x346   : > { %912 = vmatprep.mubr.f32.mxu1 %v751_v58  ;;  %v1135_v58 = vld [vmem:[#allocation5 + $0xb00] sm:$0xff]  ;;  %v2140_v28 = vpack.c.bf16 %v1157_v25, %v1155_v24 }
 0x347   : > { %913 = vmatmul.mubr.f32.gmra.mrb[14].mxu1 %v750_v59  ;;  %v1137_v59 = vld [vmem:[#allocation5 + $0xb10] sm:$0xff]  ;;  %v1290_v25 = vld [vmem:[#allocation5 + $0xc60] sm:$0xff] }
 0x348   : > { %2101 = vmatpush1.bf16.msra.mxu1 %v2100_v30  ;;  %v2120_v62 = vpack.c.bf16 %v1137_v59, %v1135_v58  ;;  %v818_v30 = vld [vmem:[#allocation7 + $0x6] sm:$0x3] }
 0x349   : > { %2103 = vmatprep.subr.bf16.mxu1 %v2102_v31  ;;  %v823_v31 = vrot.slane %v818_v30, %v2741_v33  ;;  %v827_v32 = vrot.slane %v818_v30, %v2743_v35  ;;  %v1159_v59 = vld [vmem:[#allocation5 + $0xbc0] sm:$0xff] }
 0x34a   : > { %v2144_v61 = vpack.c.bf16 %v1161_v60, %v1159_v59  ;;  %v1315_v59 = vld [vmem:[#allocation5 + $0xd28] sm:$0xff]  ;;  %v1317_v60 = vld [vmem:[#allocation5 + $0xd38] sm:$0xff] }
 0x34c   : > { %2105 = vmatpush1.bf16.msra.mxu1 %v2104_v38 }
 0x34d   : > { %2107 = vmatprep.subr.bf16.mxu1 %v2106_v39 }
 0x350   : > { %2109 = vmatpush1.bf16.msra.mxu1 %v2108_v44 }
 0x351   : > { %2111 = vmatprep.subr.bf16.mxu1 %v2110_v45 }
 0x354   : > { %2113 = vmatpush1.bf16.msra.mxu1 %v2112_v50 }
 0x355   : > { %2115 = vmatprep.subr.bf16.mxu1 %v2114_v51 }
 0x358   : > { %2117 = vmatpush1.bf16.msra.mxu1 %v2116_v56 }
 0x359   : > { %2119 = vmatprep.subr.bf16.mxu1 %v2118_v57 }
 0x35c   : > { %2121 = vmatpush1.bf16.msra.mxu1 %v2120_v62  ;;  %v1164_v62 = vld [vmem:[#allocation5 + $0xbe8] sm:$0xff] }
 0x35d   : > { %2123 = vmatprep.subr.bf16.mxu1 %v2122_v63  ;;  %v1166_v63 = vld [vmem:[#allocation5 + $0xbf8] sm:$0xff] }
 0x35e   : > { %v2146_v0 = vpack.c.bf16 %v1166_v63, %v1164_v62  ;;  %v2186_v62 = vpack.c.bf16 %v1317_v60, %v1315_v59  ;;  %v1314_v63 = vld [vmem:[#allocation5 + $0xd20] sm:$0xff]  ;;  %v1336_v59 = vld [vmem:[#allocation5 + $0xdd0] sm:$0xff] }
 0x360   : > { %2125 = vmatpush1.bf16.msra.mxu1 %v2124_v4  ;;  %v1279_v4 = vld [vmem:[#allocation5 + $0xc08] sm:$0xff] }
 0x361   : > { %2127 = vmatprep.subr.bf16.mxu1 %v2126_v5  ;;  %v1281_v5 = vld [vmem:[#allocation5 + $0xc18] sm:$0xff] }
 0x362   : > { %v2150_v7 = vpack.c.bf16 %v1281_v5, %v1279_v4  ;;  %v2190_v4 = vpack.c.bf16 %v1321_v2, %v1319_v1  ;;  %v1318_v5 = vld [vmem:[#allocation5 + $0xd40] sm:$0xff]  ;;  %v1340_v1 = vld [vmem:[#allocation5 + $0xdf0] sm:$0xff] }
 0x364   : > { %2129 = vmatpush1.bf16.msra.mxu1 %v2128_v10  ;;  %v1285_v10 = vld [vmem:[#allocation5 + $0xc38] sm:$0xff]  ;;  %2151 = vmatprep.subr.bf16.mxu0 %v2150_v7  ;;  %v1323_v7 = vld [vmem:[#allocation5 + $0xd68] sm:$0xff] }
 0x365   : > { %2131 = vmatprep.subr.bf16.mxu1 %v2130_v11  ;;  %v2152_v11 = vpack.c.bf16 %v1280_v8, %v1278_v6  ;;  %v2154_v12 = vpack.c.bf16 %v1285_v10, %v1283_v9  ;;  %v1320_v6 = vld [vmem:[#allocation5 + $0xd50] sm:$0xff]  ;;  %v1325_v8 = vld [vmem:[#allocation5 + $0xd78] sm:$0xff] }
 0x366   : > { %v2192_v9 = vpack.c.bf16 %v1320_v6, %v1318_v5  ;;  %v2194_v10 = vpack.c.bf16 %v1325_v8, %v1323_v7  ;;  %v1453_v5 = vld [vmem:[#allocation5 + $0xe00] sm:$0xff]  ;;  %v1455_v7 = vld [vmem:[#allocation5 + $0xe10] sm:$0xff]  ;;  %v1458_v8 = vld [vmem:[#allocation5 + $0xe28] sm:$0xff] }
 0x368   : > { %2133 = vmatpush1.bf16.msra.mxu1 %v2132_v16  ;;  %v1289_v16 = vld [vmem:[#allocation5 + $0xc58] sm:$0xff] }
 0x369   : > { %2135 = vmatprep.subr.bf16.mxu1 %v2134_v17  ;;  %v2156_v17 = vpack.c.bf16 %v1284_v14, %v1282_v13  ;;  %v2158_v18 = vpack.c.bf16 %v1289_v16, %v1287_v15  ;;  %v1327_v13 = vld [vmem:[#allocation5 + $0xd88] sm:$0xff]  ;;  %v1329_v14 = vld [vmem:[#allocation5 + $0xd98] sm:$0xff] }
 0x36a   : > { %v2198_v16 = vpack.c.bf16 %v1329_v14, %v1327_v13  ;;  %v1459_v13 = vld [vmem:[#allocation5 + $0xe30] sm:$0xff]  ;;  %v1462_v14 = vld [vmem:[#allocation5 + $0xe48] sm:$0xff] }
 0x36c   : > { %2137 = vmatpush1.bf16.msra.mxu1 %v2136_v22  ;;  %v1293_v22 = vld [vmem:[#allocation5 + $0xc78] sm:$0xff] }
 0x36d   : > { %2139 = vmatprep.subr.bf16.mxu1 %v2138_v23  ;;  %v2160_v23 = vpack.c.bf16 %v1288_v20, %v1286_v19  ;;  %v2162_v24 = vpack.c.bf16 %v1293_v22, %v1291_v21  ;;  %v1331_v19 = vld [vmem:[#allocation5 + $0xda8] sm:$0xff]  ;;  %v1333_v20 = vld [vmem:[#allocation5 + $0xdb8] sm:$0xff] }
 0x36e   : > { %v2202_v22 = vpack.c.bf16 %v1333_v20, %v1331_v19  ;;  %v1463_v19 = vld [vmem:[#allocation5 + $0xe50] sm:$0xff]  ;;  %v1466_v20 = vld [vmem:[#allocation5 + $0xe68] sm:$0xff] }
 0x370   : > { %2141 = vmatpush1.bf16.msra.mxu1 %v2140_v28  ;;  %v1297_v28 = vld [vmem:[#allocation5 + $0xc98] sm:$0xff] }
 0x371   : > { %2143 = vmatprep.subr.bf16.mxu1 %v2142_v29  ;;  %v2164_v29 = vpack.c.bf16 %v1292_v26, %v1290_v25  ;;  %v2166_v30 = vpack.c.bf16 %v1297_v28, %v1295_v27  ;;  %v1335_v25 = vld [vmem:[#allocation5 + $0xdc8] sm:$0xff]  ;;  %v1337_v26 = vld [vmem:[#allocation5 + $0xdd8] sm:$0xff] }
 0x372   : > { %v2206_v28 = vpack.c.bf16 %v1337_v26, %v1335_v25  ;;  %v1467_v25 = vld [vmem:[#allocation5 + $0xe70] sm:$0xff]  ;;  %v1470_v26 = vld [vmem:[#allocation5 + $0xe88] sm:$0xff] }
 0x374   : > { %2145 = vmatpush1.bf16.msra.mxu1 %v2144_v61 }
 0x375   : > { %2147 = vmatprep.subr.bf16.mxu1 %v2146_v0  ;;  %v1316_v0 = vld [vmem:[#allocation5 + $0xd30] sm:$0xff] }
 0x378   : > { %2149 = vmatpush1.bf16.msra.mxu1 %v2148_v3  ;;  %v2188_v3 = vpack.c.bf16 %v1316_v0, %v1314_v63  ;;  %v1338_v0 = vld [vmem:[#allocation5 + $0xde0] sm:$0xff] }
 0x379   : > { %v2212_v2 = vpack.c.bf16 %v1340_v1, %v1338_v0  ;;  %v1494_v0 = vld [vmem:[#allocation5 + $0xf48] sm:$0xff]  ;;  %v1496_v1 = vld [vmem:[#allocation5 + $0xf58] sm:$0xff] }
 0x40e   : > { %v896_v34 = vpop.f32.mrb[8].mxu1 }
 0x40f   : > { %v897_v36 = vadd.f32 %v896_v34, %v823_v31  ;;  %v898_v37 = vpop.f32.mrb[9].mxu1  ;;  %v1299_v34 = vld [vmem:[#allocation5 + $0xca8] sm:$0xff] }
 0x410   : > { %v899_v38 = vadd.f32 %v898_v37, %v827_v32 }
 0x411   : > { %v919_v41 = vmax.f32 %v897_v36, 0.0  ;;  %v1301_v36 = vld [vmem:[#allocation5 + $0xcb8] sm:$0xff] }
 0x412   : > { %v920_v39 = vmax.f32 %v899_v38, 0.0  ;;  %v902_v40 = vpop.f32.mrb[10].mxu1  ;;  %v2170_v38 = vpack.c.bf16 %v1301_v36, %v1299_v34 }
 0x413   : > { %v903_v42 = vadd.f32 %v902_v40, %v823_v31  ;;  %v904_v43 = vpop.f32.mrb[11].mxu1  ;;  %v1300_v40 = vld [vmem:[#allocation5 + $0xcb0] sm:$0xff] }
 0x414   : > { %v905_v44 = vadd.f32 %v904_v43, %v827_v32  ;;  %1069 = vmatprep.mubr.f32.mxu0 %v920_v39  ;;  %v1298_v39 = vld [vmem:[#allocation5 + $0xca0] sm:$0xff] }
 0x415   : > { %1070 = vmatmul.mubr.f32.vlgmr.msra.gmra.mrb[16].mxu0 %v919_v41  ;;  %v921_v47 = vmax.f32 %v903_v42, 0.0  ;;  %v1303_v41 = vld [vmem:[#allocation5 + $0xcc8] sm:$0xff]  ;;  %v1305_v42 = vld [vmem:[#allocation5 + $0xcd8] sm:$0xff]  ;;  %v2172_v43 = vpack.c.bf16 %v1300_v40, %v1298_v39 }
 0x416   : > { %v922_v45 = vmax.f32 %v905_v44, 0.0  ;;  %v908_v46 = vpop.f32.mrb[12].mxu1  ;;  %2153 = vmatpush1.bf16.msra.mxu0 %v2152_v11  ;;  %v2174_v44 = vpack.c.bf16 %v1305_v42, %v1303_v41  ;;  %v1322_v11 = vld [vmem:[#allocation5 + $0xd60] sm:$0xff] }
 0x417   : > { %v909_v48 = vadd.f32 %v908_v46, %v823_v31  ;;  %v910_v49 = vpop.f32.mrb[13].mxu1  ;;  %2155 = vmatprep.subr.bf16.mxu0 %v2154_v12  ;;  %v1304_v46 = vld [vmem:[#allocation5 + $0xcd0] sm:$0xff] }
 0x418   : > { %v911_v50 = vadd.f32 %v910_v49, %v827_v32  ;;  %1075 = vmatprep.mubr.f32.mxu0 %v922_v45  ;;  %v1302_v45 = vld [vmem:[#allocation5 + $0xcc0] sm:$0xff]  ;;  %v1324_v12 = vld [vmem:[#allocation5 + $0xd70] sm:$0xff] }
 0x419   : > { %1076 = vmatmul.mubr.f32.gmra.mrb[18].mxu0 %v921_v47  ;;  %v923_v53 = vmax.f32 %v909_v48, 0.0  ;;  %v1307_v47 = vld [vmem:[#allocation5 + $0xce8] sm:$0xff]  ;;  %v1309_v48 = vld [vmem:[#allocation5 + $0xcf8] sm:$0xff]  ;;  %v2176_v49 = vpack.c.bf16 %v1304_v46, %v1302_v45  ;;  %v2196_v15 = vpack.c.bf16 %v1324_v12, %v1322_v11  ;;  %v1457_v12 = vld [vmem:[#allocation5 + $0xe20] sm:$0xff] }
 0x41a   : > { %v924_v51 = vmax.f32 %v911_v50, 0.0  ;;  %v914_v52 = vpop.f32.mrb[14].mxu1  ;;  %2157 = vmatpush1.bf16.msra.mxu0 %v2156_v17  ;;  %v2178_v50 = vpack.c.bf16 %v1309_v48, %v1307_v47  ;;  %v1326_v17 = vld [vmem:[#allocation5 + $0xd80] sm:$0xff] }
 0x41b   : > { %v915_v54 = vadd.f32 %v914_v52, %v823_v31  ;;  %v916_v55 = vpop.f32.mrb[15].mxu1  ;;  %2159 = vmatprep.subr.bf16.mxu0 %v2158_v18  ;;  %v1294_v31 = vld [vmem:[#allocation5 + $0xc80] sm:$0xff]  ;;  %v1308_v52 = vld [vmem:[#allocation5 + $0xcf0] sm:$0xff] }
 0x41c   : > { %v917_v56 = vadd.f32 %v916_v55, %v827_v32  ;;  %1081 = vmatprep.mubr.f32.mxu0 %v924_v51  ;;  %v1296_v32 = vld [vmem:[#allocation5 + $0xc90] sm:$0xff]  ;;  %v1306_v51 = vld [vmem:[#allocation5 + $0xce0] sm:$0xff] }
 0x41d   : > { %1082 = vmatmul.mubr.f32.gmra.mrb[20].mxu0 %v923_v53  ;;  %v925_v58 = vmax.f32 %v915_v54, 0.0  ;;  %v2168_v37 = vpack.c.bf16 %v1296_v32, %v1294_v31  ;;  %v1311_v53 = vld [vmem:[#allocation5 + $0xd08] sm:$0xff]  ;;  %v1313_v54 = vld [vmem:[#allocation5 + $0xd18] sm:$0xff]  ;;  %v2180_v55 = vpack.c.bf16 %v1308_v52, %v1306_v51  ;;  %v1328_v18 = vld [vmem:[#allocation5 + $0xd90] sm:$0xff] }
 0x41e   : > { %v926_v57 = vmax.f32 %v917_v56, 0.0  ;;  %2161 = vmatpush1.bf16.msra.mxu0 %v2160_v23  ;;  %v2182_v56 = vpack.c.bf16 %v1313_v54, %v1311_v53  ;;  %v2200_v21 = vpack.c.bf16 %v1328_v18, %v1326_v17  ;;  %v1330_v23 = vld [vmem:[#allocation5 + $0xda0] sm:$0xff] }
 0x41f   : > { %2163 = vmatprep.subr.bf16.mxu0 %v2162_v24  ;;  %v1332_v24 = vld [vmem:[#allocation5 + $0xdb0] sm:$0xff]  ;;  %v1461_v18 = vld [vmem:[#allocation5 + $0xe40] sm:$0xff] }
 0x420   : > { %1087 = vmatprep.mubr.f32.mxu0 %v926_v57  ;;  %v1310_v57 = vld [vmem:[#allocation5 + $0xd00] sm:$0xff]  ;;  %v2204_v27 = vpack.c.bf16 %v1332_v24, %v1330_v23 }
 0x421   : > { %1088 = vmatmul.mubr.f32.gmra.mrb[22].mxu0 %v925_v58  ;;  %v1312_v58 = vld [vmem:[#allocation5 + $0xd10] sm:$0xff]  ;;  %v1465_v24 = vld [vmem:[#allocation5 + $0xe60] sm:$0xff] }
 0x422   : > { %2165 = vmatpush1.bf16.msra.mxu0 %v2164_v29  ;;  %v2184_v61 = vpack.c.bf16 %v1312_v58, %v1310_v57  ;;  %v993_v29 = vld [vmem:[#allocation7 + $0x8] sm:$0x3]  ;;  %v1334_v58 = vld [vmem:[#allocation5 + $0xdc0] sm:$0xff] }
 0x423   : > { %2167 = vmatprep.subr.bf16.mxu0 %v2166_v30  ;;  %v998_v30 = vrot.slane %v993_v29, %v2741_v33  ;;  %v1002_v31 = vrot.slane %v993_v29, %v2743_v35  ;;  %v2208_v60 = vpack.c.bf16 %v1336_v59, %v1334_v58  ;;  %v1490_v58 = vld [vmem:[#allocation5 + $0xf28] sm:$0xff]  ;;  %v1492_v59 = vld [vmem:[#allocation5 + $0xf38] sm:$0xff] }
 0x426   : > { %2169 = vmatpush1.bf16.msra.mxu0 %v2168_v37 }
 0x427   : > { %2171 = vmatprep.subr.bf16.mxu0 %v2170_v38 }
 0x42a   : > { %2173 = vmatpush1.bf16.msra.mxu0 %v2172_v43 }
 0x42b   : > { %2175 = vmatprep.subr.bf16.mxu0 %v2174_v44 }
 0x42e   : > { %2177 = vmatpush1.bf16.msra.mxu0 %v2176_v49 }
 0x42f   : > { %2179 = vmatprep.subr.bf16.mxu0 %v2178_v50 }
 0x432   : > { %2181 = vmatpush1.bf16.msra.mxu0 %v2180_v55 }
 0x433   : > { %2183 = vmatprep.subr.bf16.mxu0 %v2182_v56 }
 0x436   : > { %2185 = vmatpush1.bf16.msra.mxu0 %v2184_v61  ;;  %v1339_v61 = vld [vmem:[#allocation5 + $0xde8] sm:$0xff] }
 0x437   : > { %2187 = vmatprep.subr.bf16.mxu0 %v2186_v62  ;;  %v1341_v62 = vld [vmem:[#allocation5 + $0xdf8] sm:$0xff] }
 0x438   : > { %v2210_v63 = vpack.c.bf16 %v1341_v62, %v1339_v61  ;;  %v2250_v61 = vpack.c.bf16 %v1492_v59, %v1490_v58  ;;  %v1489_v62 = vld [vmem:[#allocation5 + $0xf20] sm:$0xff]  ;;  %v1511_v58 = vld [vmem:[#allocation5 + $0xfd0] sm:$0xff] }
 0x43a   : > { %2189 = vmatpush1.bf16.msra.mxu0 %v2188_v3  ;;  %v1454_v3 = vld [vmem:[#allocation5 + $0xe08] sm:$0xff] }
 0x43b   : > { %2191 = vmatprep.subr.bf16.mxu0 %v2190_v4  ;;  %v1456_v4 = vld [vmem:[#allocation5 + $0xe18] sm:$0xff] }
 0x43c   : > { %v2214_v6 = vpack.c.bf16 %v1456_v4, %v1454_v3  ;;  %v2254_v3 = vpack.c.bf16 %v1496_v1, %v1494_v0  ;;  %v1493_v4 = vld [vmem:[#allocation5 + $0xf40] sm:$0xff]  ;;  %v1515_v0 = vld [vmem:[#allocation5 + $0xff0] sm:$0xff] }
 0x43e   : > { %2193 = vmatpush1.bf16.msra.mxu0 %v2192_v9  ;;  %v1460_v9 = vld [vmem:[#allocation5 + $0xe38] sm:$0xff]  ;;  %2215 = vmatprep.subr.bf16.mxu1 %v2214_v6  ;;  %v1498_v6 = vld [vmem:[#allocation5 + $0xf68] sm:$0xff] }
 0x43f   : > { %2195 = vmatprep.subr.bf16.mxu0 %v2194_v10  ;;  %v2216_v10 = vpack.c.bf16 %v1455_v7, %v1453_v5  ;;  %v2218_v11 = vpack.c.bf16 %v1460_v9, %v1458_v8  ;;  %v1495_v5 = vld [vmem:[#allocation5 + $0xf50] sm:$0xff]  ;;  %v1500_v7 = vld [vmem:[#allocation5 + $0xf78] sm:$0xff] }
 0x440   : > { %v2256_v8 = vpack.c.bf16 %v1495_v5, %v1493_v4  ;;  %v2258_v9 = vpack.c.bf16 %v1500_v7, %v1498_v6 }
 0x442   : > { %2197 = vmatpush1.bf16.msra.mxu0 %v2196_v15  ;;  %v1464_v15 = vld [vmem:[#allocation5 + $0xe58] sm:$0xff] }
 0x443   : > { %2199 = vmatprep.subr.bf16.mxu0 %v2198_v16  ;;  %v2220_v16 = vpack.c.bf16 %v1459_v13, %v1457_v12  ;;  %v2222_v17 = vpack.c.bf16 %v1464_v15, %v1462_v14  ;;  %v1502_v12 = vld [vmem:[#allocation5 + $0xf88] sm:$0xff]  ;;  %v1504_v13 = vld [vmem:[#allocation5 + $0xf98] sm:$0xff] }
 0x444   : > { %v2262_v15 = vpack.c.bf16 %v1504_v13, %v1502_v12 }
 0x446   : > { %2201 = vmatpush1.bf16.msra.mxu0 %v2200_v21  ;;  %v1468_v21 = vld [vmem:[#allocation5 + $0xe78] sm:$0xff] }
 0x447   : > { %2203 = vmatprep.subr.bf16.mxu0 %v2202_v22  ;;  %v2224_v22 = vpack.c.bf16 %v1463_v19, %v1461_v18  ;;  %v2226_v23 = vpack.c.bf16 %v1468_v21, %v1466_v20  ;;  %v1506_v18 = vld [vmem:[#allocation5 + $0xfa8] sm:$0xff]  ;;  %v1508_v19 = vld [vmem:[#allocation5 + $0xfb8] sm:$0xff] }
 0x448   : > { %v2266_v21 = vpack.c.bf16 %v1508_v19, %v1506_v18 }
 0x44a   : > { %2205 = vmatpush1.bf16.msra.mxu0 %v2204_v27  ;;  %v1472_v27 = vld [vmem:[#allocation5 + $0xe98] sm:$0xff] }
 0x44b   : > { %2207 = vmatprep.subr.bf16.mxu0 %v2206_v28  ;;  %v2228_v28 = vpack.c.bf16 %v1467_v25, %v1465_v24  ;;  %v2230_v29 = vpack.c.bf16 %v1472_v27, %v1470_v26  ;;  %v1510_v24 = vld [vmem:[#allocation5 + $0xfc8] sm:$0xff]  ;;  %v1512_v25 = vld [vmem:[#allocation5 + $0xfd8] sm:$0xff] }
 0x44c   : > { %v2270_v27 = vpack.c.bf16 %v1512_v25, %v1510_v24 }
 0x44e   : > { %2209 = vmatpush1.bf16.msra.mxu0 %v2208_v60 }
 0x44f   : > { %2211 = vmatprep.subr.bf16.mxu0 %v2210_v63  ;;  %v1491_v63 = vld [vmem:[#allocation5 + $0xf30] sm:$0xff] }
 0x452   : > { %2213 = vmatpush1.bf16.msra.mxu0 %v2212_v2  ;;  %v2252_v2 = vpack.c.bf16 %v1491_v63, %v1489_v62  ;;  %v1513_v63 = vld [vmem:[#allocation5 + $0xfe0] sm:$0xff] }
 0x453   : > { %v2276_v1 = vpack.c.bf16 %v1515_v0, %v1513_v63 }
 0x4e8   : > { %v1071_v32 = vpop.f32.mrb[16].mxu0 }
 0x4e9   : > { %v1072_v34 = vadd.f32 %v1071_v32, %v998_v30  ;;  %v1073_v36 = vpop.f32.mrb[17].mxu0  ;;  %v1474_v32 = vld [vmem:[#allocation5 + $0xea8] sm:$0xff] }
 0x4ea   : > { %v1074_v37 = vadd.f32 %v1073_v36, %v1002_v31 }
 0x4eb   : > { %v1094_v40 = vmax.f32 %v1072_v34, 0.0  ;;  %v1476_v34 = vld [vmem:[#allocation5 + $0xeb8] sm:$0xff] }
 0x4ec   : > { %v1095_v38 = vmax.f32 %v1074_v37, 0.0  ;;  %v1077_v39 = vpop.f32.mrb[18].mxu0  ;;  %v2234_v37 = vpack.c.bf16 %v1476_v34, %v1474_v32 }
 0x4ed   : > { %v1078_v41 = vadd.f32 %v1077_v39, %v998_v30  ;;  %v1079_v42 = vpop.f32.mrb[19].mxu0  ;;  %v1475_v39 = vld [vmem:[#allocation5 + $0xeb0] sm:$0xff] }
 0x4ee   : > { %v1080_v43 = vadd.f32 %v1079_v42, %v1002_v31  ;;  %1244 = vmatprep.mubr.f32.mxu1 %v1095_v38  ;;  %v1473_v38 = vld [vmem:[#allocation5 + $0xea0] sm:$0xff] }
 0x4ef   : > { %1245 = vmatmul.mubr.f32.vlgmr.msra.gmra.mrb[16].mxu1 %v1094_v40  ;;  %v1096_v46 = vmax.f32 %v1078_v41, 0.0  ;;  %v1478_v40 = vld [vmem:[#allocation5 + $0xec8] sm:$0xff]  ;;  %v1480_v41 = vld [vmem:[#allocation5 + $0xed8] sm:$0xff]  ;;  %v2236_v42 = vpack.c.bf16 %v1475_v39, %v1473_v38 }
 0x4f0   : > { %v1097_v44 = vmax.f32 %v1080_v43, 0.0  ;;  %v1083_v45 = vpop.f32.mrb[20].mxu0  ;;  %2217 = vmatpush1.bf16.msra.mxu1 %v2216_v10  ;;  %v2238_v43 = vpack.c.bf16 %v1480_v41, %v1478_v40  ;;  %v1497_v10 = vld [vmem:[#allocation5 + $0xf60] sm:$0xff] }
 0x4f1   : > { %v1084_v47 = vadd.f32 %v1083_v45, %v998_v30  ;;  %v1085_v48 = vpop.f32.mrb[21].mxu0  ;;  %2219 = vmatprep.subr.bf16.mxu1 %v2218_v11  ;;  %v1479_v45 = vld [vmem:[#allocation5 + $0xed0] sm:$0xff] }
 0x4f2   : > { %v1086_v49 = vadd.f32 %v1085_v48, %v1002_v31  ;;  %1250 = vmatprep.mubr.f32.mxu1 %v1097_v44  ;;  %v1477_v44 = vld [vmem:[#allocation5 + $0xec0] sm:$0xff]  ;;  %v1499_v11 = vld [vmem:[#allocation5 + $0xf70] sm:$0xff] }
 0x4f3   : > { %1251 = vmatmul.mubr.f32.gmra.mrb[18].mxu1 %v1096_v46  ;;  %v1098_v52 = vmax.f32 %v1084_v47, 0.0  ;;  %v1482_v46 = vld [vmem:[#allocation5 + $0xee8] sm:$0xff]  ;;  %v1484_v47 = vld [vmem:[#allocation5 + $0xef8] sm:$0xff]  ;;  %v2240_v48 = vpack.c.bf16 %v1479_v45, %v1477_v44  ;;  %v2260_v14 = vpack.c.bf16 %v1499_v11, %v1497_v10 }
 0x4f4   : > { %v1099_v50 = vmax.f32 %v1086_v49, 0.0  ;;  %v1089_v51 = vpop.f32.mrb[22].mxu0  ;;  %2221 = vmatpush1.bf16.msra.mxu1 %v2220_v16  ;;  %v2242_v49 = vpack.c.bf16 %v1484_v47, %v1482_v46  ;;  %v1501_v16 = vld [vmem:[#allocation5 + $0xf80] sm:$0xff] }
 0x4f5   : > { %v1090_v53 = vadd.f32 %v1089_v51, %v998_v30  ;;  %v1091_v54 = vpop.f32.mrb[23].mxu0  ;;  %2223 = vmatprep.subr.bf16.mxu1 %v2222_v17  ;;  %v1469_v30 = vld [vmem:[#allocation5 + $0xe80] sm:$0xff]  ;;  %v1483_v51 = vld [vmem:[#allocation5 + $0xef0] sm:$0xff] }
 0x4f6   : > { %v1092_v55 = vadd.f32 %v1091_v54, %v1002_v31  ;;  %1256 = vmatprep.mubr.f32.mxu1 %v1099_v50  ;;  %v1471_v31 = vld [vmem:[#allocation5 + $0xe90] sm:$0xff]  ;;  %v1481_v50 = vld [vmem:[#allocation5 + $0xee0] sm:$0xff] }
 0x4f7   : > { %1257 = vmatmul.mubr.f32.gmra.mrb[20].mxu1 %v1098_v52  ;;  %v1100_v57 = vmax.f32 %v1090_v53, 0.0  ;;  %v2232_v36 = vpack.c.bf16 %v1471_v31, %v1469_v30  ;;  %v1486_v52 = vld [vmem:[#allocation5 + $0xf08] sm:$0xff]  ;;  %v1488_v53 = vld [vmem:[#allocation5 + $0xf18] sm:$0xff]  ;;  %v2244_v54 = vpack.c.bf16 %v1483_v51, %v1481_v50  ;;  %v1503_v17 = vld [vmem:[#allocation5 + $0xf90] sm:$0xff] }
 0x4f8   : > { %v1101_v56 = vmax.f32 %v1092_v55, 0.0  ;;  %2225 = vmatpush1.bf16.msra.mxu1 %v2224_v22  ;;  %v2246_v55 = vpack.c.bf16 %v1488_v53, %v1486_v52  ;;  %v2264_v20 = vpack.c.bf16 %v1503_v17, %v1501_v16  ;;  %v1505_v22 = vld [vmem:[#allocation5 + $0xfa0] sm:$0xff] }
 0x4f9   : > { %2227 = vmatprep.subr.bf16.mxu1 %v2226_v23  ;;  %v1507_v23 = vld [vmem:[#allocation5 + $0xfb0] sm:$0xff] }
 0x4fa   : > { %1262 = vmatprep.mubr.f32.mxu1 %v1101_v56  ;;  %v1485_v56 = vld [vmem:[#allocation5 + $0xf00] sm:$0xff]  ;;  %v2268_v26 = vpack.c.bf16 %v1507_v23, %v1505_v22 }
 0x4fb   : > { %1263 = vmatmul.mubr.f32.gmra.mrb[22].mxu1 %v1100_v57  ;;  %v1487_v57 = vld [vmem:[#allocation5 + $0xf10] sm:$0xff] }
 0x4fc   : > { %2229 = vmatpush1.bf16.msra.mxu1 %v2228_v28  ;;  %v2248_v60 = vpack.c.bf16 %v1487_v57, %v1485_v56  ;;  %v1168_v28 = vld [vmem:[#allocation7 + $0xa] sm:$0x3]  ;;  %v1509_v57 = vld [vmem:[#allocation5 + $0xfc0] sm:$0xff] }
 0x4fd   : > { %2231 = vmatprep.subr.bf16.mxu1 %v2230_v29  ;;  %v1173_v29 = vrot.slane %v1168_v28, %v2741_v33  ;;  %v1177_v30 = vrot.slane %v1168_v28, %v2743_v35  ;;  %v2272_v59 = vpack.c.bf16 %v1511_v58, %v1509_v57 }
 0x500   : > { %2233 = vmatpush1.bf16.msra.mxu1 %v2232_v36 }
 0x501   : > { %2235 = vmatprep.subr.bf16.mxu1 %v2234_v37 }
 0x504   : > { %2237 = vmatpush1.bf16.msra.mxu1 %v2236_v42 }
 0x505   : > { %2239 = vmatprep.subr.bf16.mxu1 %v2238_v43 }
 0x508   : > { %2241 = vmatpush1.bf16.msra.mxu1 %v2240_v48 }
 0x509   : > { %2243 = vmatprep.subr.bf16.mxu1 %v2242_v49 }
 0x50c   : > { %2245 = vmatpush1.bf16.msra.mxu1 %v2244_v54 }
 0x50d   : > { %2247 = vmatprep.subr.bf16.mxu1 %v2246_v55 }
 0x510   : > { %2249 = vmatpush1.bf16.msra.mxu1 %v2248_v60  ;;  %v1514_v60 = vld [vmem:[#allocation5 + $0xfe8] sm:$0xff] }
 0x511   : > { %2251 = vmatprep.subr.bf16.mxu1 %v2250_v61  ;;  %v1516_v61 = vld [vmem:[#allocation5 + $0xff8] sm:$0xff] }
 0x512   : > { %v2274_v62 = vpack.c.bf16 %v1516_v61, %v1514_v60 }
 0x514   : > { %2253 = vmatpush1.bf16.msra.mxu1 %v2252_v2  ;;  %v1343_v2 = vld [vmem:[#allocation7 + $0xc] sm:$0x3] }
 0x515   : > { %2255 = vmatprep.subr.bf16.mxu1 %v2254_v3  ;;  %v1348_v3 = vrot.slane %v1343_v2, %v2741_v33  ;;  %v1352_v4 = vrot.slane %v1343_v2, %v2743_v35 }
 0x518   : > { %2257 = vmatpush1.bf16.msra.mxu1 %v2256_v8 }
 0x519   : > { %2259 = vmatprep.subr.bf16.mxu1 %v2258_v9 }
 0x51c   : > { %2261 = vmatpush1.bf16.msra.mxu1 %v2260_v14 }
 0x51d   : > { %2263 = vmatprep.subr.bf16.mxu1 %v2262_v15 }
 0x520   : > { %2265 = vmatpush1.bf16.msra.mxu1 %v2264_v20 }
 0x521   : > { %2267 = vmatprep.subr.bf16.mxu1 %v2266_v21 }
 0x524   : > { %2269 = vmatpush1.bf16.msra.mxu1 %v2268_v26 }
 0x525   : > { %2271 = vmatprep.subr.bf16.mxu1 %v2270_v27 }
 0x528   : > { %2273 = vmatpush1.bf16.msra.mxu1 %v2272_v59 }
 0x529   : > { %2275 = vmatprep.subr.bf16.mxu1 %v2274_v62 }
 0x52c   : > { %2277 = vmatpush1.bf16.msra.mxu1 %v2276_v1 }
 0x5c2   : > { %v1246_v31 = vpop.f32.mrb[16].mxu1 }
 0x5c3   : > { %v1247_v32 = vadd.f32 %v1246_v31, %v1173_v29  ;;  %v1248_v34 = vpop.f32.mrb[17].mxu1 }
 0x5c4   : > { %v1249_v36 = vadd.f32 %v1248_v34, %v1177_v30 }
 0x5c5   : > { %v1269_v39 = vmax.f32 %v1247_v32, 0.0 }
 0x5c6   : > { %v1270_v37 = vmax.f32 %v1249_v36, 0.0  ;;  %v1252_v38 = vpop.f32.mrb[18].mxu1 }
 0x5c7   : > { %v1253_v40 = vadd.f32 %v1252_v38, %v1173_v29  ;;  %v1254_v41 = vpop.f32.mrb[19].mxu1 }
 0x5c8   : > { %v1255_v42 = vadd.f32 %v1254_v41, %v1177_v30  ;;  %1419 = vmatprep.mubr.f32.mxu0 %v1270_v37 }
 0x5c9   : > { %1420 = vmatmul.mubr.f32.vlgmr.msra.gmra.mrb[24].mxu0 %v1269_v39  ;;  %v1271_v45 = vmax.f32 %v1253_v40, 0.0 }
 0x5ca   : > { %v1272_v43 = vmax.f32 %v1255_v42, 0.0  ;;  %v1258_v44 = vpop.f32.mrb[20].mxu1 }
 0x5cb   : > { %v1259_v46 = vadd.f32 %v1258_v44, %v1173_v29  ;;  %v1260_v47 = vpop.f32.mrb[21].mxu1 }
 0x5cc   : > { %v1261_v48 = vadd.f32 %v1260_v47, %v1177_v30  ;;  %1425 = vmatprep.mubr.f32.mxu0 %v1272_v43 }
 0x5cd   : > { %1426 = vmatmul.mubr.f32.gmra.mrb[26].mxu0 %v1271_v45  ;;  %v1273_v51 = vmax.f32 %v1259_v46, 0.0 }
 0x5ce   : > { %v1274_v49 = vmax.f32 %v1261_v48, 0.0  ;;  %v1264_v50 = vpop.f32.mrb[22].mxu1 }
 0x5cf   : > { %v1265_v52 = vadd.f32 %v1264_v50, %v1173_v29  ;;  %v1266_v53 = vpop.f32.mrb[23].mxu1  ;;  %v1518_v29 = vld [vmem:[#allocation7 + $0xe] sm:$0x3] }
 0x5d0   : > { %v1267_v54 = vadd.f32 %v1266_v53, %v1177_v30  ;;  %1431 = vmatprep.mubr.f32.mxu0 %v1274_v49  ;;  %v1523_v30 = vrot.slane %v1518_v29, %v2741_v33  ;;  %v1527_v31 = vrot.slane %v1518_v29, %v2743_v35 }
 0x5d1   : > { %1432 = vmatmul.mubr.f32.gmra.mrb[28].mxu0 %v1273_v51  ;;  %v1275_v56 = vmax.f32 %v1265_v52, 0.0 }
 0x5d2   : > { %v1276_v55 = vmax.f32 %v1267_v54, 0.0 }
 0x5d4   : > { %1437 = vmatprep.mubr.f32.mxu0 %v1276_v55 }
 0x5d5   : > { %1438 = vmatmul.mubr.f32.gmra.mrb[30].mxu0 %v1275_v56 }
 0x69c   : > { %v1421_v5 = vpop.f32.mrb[24].mxu0 }
 0x69d   : > { %v1422_v6 = vadd.f32 %v1421_v5, %v1348_v3  ;;  %v1423_v7 = vpop.f32.mrb[25].mxu0 }
 0x69e   : > { %v1424_v8 = vadd.f32 %v1423_v7, %v1352_v4 }
 0x69f   : > { %v1444_v11 = vmax.f32 %v1422_v6, 0.0 }
 0x6a0   : > { %v1445_v9 = vmax.f32 %v1424_v8, 0.0  ;;  %v1427_v10 = vpop.f32.mrb[26].mxu0 }
 0x6a1   : > { %v1428_v12 = vadd.f32 %v1427_v10, %v1348_v3  ;;  %v1429_v13 = vpop.f32.mrb[27].mxu0 }
 0x6a2   : > { %v1430_v14 = vadd.f32 %v1429_v13, %v1352_v4  ;;  %1594 = vmatprep.mubr.f32.mxu1 %v1445_v9 }
 0x6a3   : > { %1595 = vmatmul.mubr.f32.vlgmr.msra.gmra.mrb[24].mxu1 %v1444_v11  ;;  %v1446_v17 = vmax.f32 %v1428_v12, 0.0 }
 0x6a4   : > { %v1447_v15 = vmax.f32 %v1430_v14, 0.0  ;;  %v1433_v16 = vpop.f32.mrb[28].mxu0 }
 0x6a5   : > { %v1434_v18 = vadd.f32 %v1433_v16, %v1348_v3  ;;  %v1435_v19 = vpop.f32.mrb[29].mxu0 }
 0x6a6   : > { %v1436_v20 = vadd.f32 %v1435_v19, %v1352_v4  ;;  %1600 = vmatprep.mubr.f32.mxu1 %v1447_v15 }
 0x6a7   : > { %1601 = vmatmul.mubr.f32.gmra.mrb[26].mxu1 %v1446_v17  ;;  %v1448_v23 = vmax.f32 %v1434_v18, 0.0 }
 0x6a8   : > { %v1449_v21 = vmax.f32 %v1436_v20, 0.0  ;;  %v1439_v22 = vpop.f32.mrb[30].mxu0 }
 0x6a9   : > { %v1440_v24 = vadd.f32 %v1439_v22, %v1348_v3  ;;  %v1441_v25 = vpop.f32.mrb[31].mxu0 }
 0x6aa   : > { %v1442_v26 = vadd.f32 %v1441_v25, %v1352_v4  ;;  %1606 = vmatprep.mubr.f32.mxu1 %v1449_v21 }
 0x6ab   : > { %1607 = vmatmul.mubr.f32.gmra.mrb[28].mxu1 %v1448_v23  ;;  %v1450_v28 = vmax.f32 %v1440_v24, 0.0 }
 0x6ac   : > { %v1451_v27 = vmax.f32 %v1442_v26, 0.0 }
 0x6ae   : > { %1612 = vmatprep.mubr.f32.mxu1 %v1451_v27 }
 0x6af   : > { %1613 = vmatmul.mubr.f32.gmra.mrb[30].mxu1 %v1450_v28 }
 0x776   : > { %v1596_v32 = vpop.f32.mrb[24].mxu1 }
 0x777   : > { %v1597_v34 = vadd.f32 %v1596_v32, %v1523_v30  ;;  %v1598_v36 = vpop.f32.mrb[25].mxu1 }
 0x778   : > { %v1599_v37 = vadd.f32 %v1598_v36, %v1527_v31 }
 0x779   : > { %v1619_v38 = vmax.f32 %v1597_v34, 0.0 }
 0x77a   : > { %v1620_v39 = vmax.f32 %v1599_v37, 0.0  ;;  %v1602_v40 = vpop.f32.mrb[26].mxu1 }
 0x77b   : > { %1627 = vst [vmem:[%s218_s18] sm:$0xff] %v1619_v38  ;;  %v1603_v41 = vadd.f32 %v1602_v40, %v1523_v30  ;;  %v1604_v42 = vpop.f32.mrb[27].mxu1 }
 0x77c   : > { %1628 = vst [vmem:[%s218_s18 + $0x8] sm:$0xff] %v1620_v39  ;;  %v1605_v43 = vadd.f32 %v1604_v42, %v1527_v31 }
 0x77d   : > { %v1621_v44 = vmax.f32 %v1603_v41, 0.0 }
 0x77e   : > { %v1622_v45 = vmax.f32 %v1605_v43, 0.0  ;;  %v1608_v33 = vpop.f32.mrb[28].mxu1 }
 0x77f   : > { %1629 = vst [vmem:[%s218_s18 + $0x10] sm:$0xff] %v1621_v44  ;;  %v1609_v35 = vadd.f32 %v1608_v33, %v1523_v30  ;;  %v1610_v46 = vpop.f32.mrb[29].mxu1 }
 0x780   : > { %1630 = vst [vmem:[%s218_s18 + $0x18] sm:$0xff] %v1622_v45  ;;  %v1611_v47 = vadd.f32 %v1610_v46, %v1527_v31 }
 0x781   : > { %v1623_v48 = vmax.f32 %v1609_v35, 0.0 }
 0x782   : > { %v1624_v49 = vmax.f32 %v1611_v47, 0.0  ;;  %v1614_v50 = vpop.f32.mrb[30].mxu1 }
 0x783   : > { %1631 = vst [vmem:[%s218_s18 + $0x20] sm:$0xff] %v1623_v48  ;;  %v1615_v51 = vadd.f32 %v1614_v50, %v1523_v30  ;;  %v1616_v52 = vpop.f32.mrb[31].mxu1 }
 0x784   : > { %1632 = vst [vmem:[%s218_s18 + $0x28] sm:$0xff] %v1624_v49  ;;  %v1617_v53 = vadd.f32 %v1616_v52, %v1527_v31 }
 0x785   : > { %v1625_v54 = vmax.f32 %v1615_v51, 0.0 }
 0x786   : > { %v1626_v55 = vmax.f32 %v1617_v53, 0.0 }
 0x787   : > { %1633 = vst [vmem:[%s218_s18 + $0x30] sm:$0xff] %v1625_v54 }
 0x788   : > { %1634 = vst [vmem:[%s218_s18 + $0x38] sm:$0xff] %v1626_v55 }
 0x789   : > { %2450 = shalt.err (!%p2447_p1)
}
 0x78a   : > { %s2451_s23 = scalar_lea.hbm %s2769_s22, 1024  ;;  %s2455_s28 = scalar_lea.hbm %s2816_s3, 2048 }
 0x78b   : > { %p2452_p13 = scmp.ne.s32.totalorder %s2769_s22, %s2451_s23  ;;  %p2456_p4 = scmp.lt.u32.totalorder %s2769_s22, %s2816_s3 }
 0x78c   : > { %p2457_p7 = scmp.lt.u32.totalorder %s2455_s28, %s2451_s23  ;;  %p2459_p11 = scmp.lt.u32.totalorder %s2451_s23, %s2769_s22 }
 0x78d   : > { %p2453_p6 = pnand %p2452_p13, %p2830_p0 }
 0x78e   : > { %p2458_p8 = por %p2457_p7, %p2456_p4 }
 0x78f   : > { %p2454_p10 = pneg %p2453_p6 }
 0x790   : > { %p2460_p2 = por %p2459_p11, %p2458_p8 }
 0x792   : > { %p2461_p3 = pnand %p2460_p2, %p2454_p10 }
 0x794   : > { %2464 = shalt.err (!%p2461_p3)
}
 0x795   : > { %s2517_s29 = smov 256   ;;  %s2518_s18 = smov 16  }
 0x796   : > { %2288 = dma.vmem_to_hbm [thread:$0]  (%p2830_p0), %s2764_s20, 1024, %s2769_s22, %s1636_s16, %s2517_s29, %s2517_s29, %s2518_s18  }
 0x797 PF: > { %s1665_s7 = sand.u32 1, %s2495_s12   ;;  %p2831_p5 = scmp.ne.s32.totalorder %s2821_s19, 0 }
 0x798   : > { %p2832_p9 = scmp.ge.s32.totalorder %s2507_s15, 2  ;;  %s1666_s8 = scalar_lea.sflag [#allocation4], %s1665_s7 }
 0x79a   : > { %p2302_p12 = pnand %p2832_p9, %p2831_p5 }
 0x79c   : > { %2490 = dma.done.wait (!%p2302_p12), %s1666_s8, 1024  }
 0x79d   : > { %2492 = vsyncadd (!%p2302_p12), %s1666_s8, 4294966272  ;;  %p17_p1 = scmp.ge.s32.totalorder %s2652_s6, 4   ;;  %s2833_s12 = smov %s2499_s13 }
 0x79e   : > { %s2834_s13 = smov %s2503_s14  ;;  %s2835_s14 = smov %s2661_s11 }
 0x79f   : > { %s2836_s15 = smov %s2652_s6  ;;  %19 = sbr.rel (!%p17_p1) target bundleno = 6 (0x6), region = 99 }
 0x7a6   :  { %1671 = vsyncpa [#allocation3], 1 }
 0x7a7   :  { %1673 = vsyncpa [#allocation3 + $0x1], 1 }
 0x7a8   :  { %1674 = vsyncpa [#allocation6], 1 }
 0x7a9   :  { %1675 = vsyncpa [#allocation4], 1 }
 0x7aa   :  { %1677 = vsyncpa [#allocation4 + $0x1], 1 }

</bundles_post_ra>
